<compile_context>
chip_gen: v6e
topology: v6e:2x2x1
jax: 0.10.0
libtpu: 0.0.40
codegen_flags: <defaults>
</compile_context>

<pallas_src>
import math
from functools import partial

import numpy as np
import jax
import jax.numpy as jnp
from jax.experimental import pallas as pl
from jax.experimental.pallas import tpu as pltpu


# --------------------------------------------------------------------------
# Fused Pallas kernel: stem -> blocks -> pool -> head (per batch element)
# --------------------------------------------------------------------------

def _make_fused_kernel(depth, kk):
    """All matmuls use M=rows(16), N=Dp(128); `h` stays resident in VMEM."""

    def kernel(patches_ref, wstem_ref, stemv_ref, shift_ref, dww_ref, pww_ref,
               blkv_ref, whead_ref, bhead_ref, o_ref):
        rows = patches_ref[0]                                   # (Rb, K) im2col rows
        sv = stemv_ref[...]                                     # (3, Dp): bias/scale/shift

        # ---- stem: Conv(9C->dim, k=P, s=P) as one matmul, + bias, ReLU, BN ----
        z = jnp.dot(rows, wstem_ref[...], preferred_element_type=jnp.float32)
        h = jnp.maximum(z + sv[0:1], 0.0) * sv[1:2] + sv[2:3]   # (Rb, Dp)

        shifts = shift_ref[...]                                 # (kk, Rb, Rb) 0/1 taps
        for d in range(depth):                                  # static unroll over depth
            dww = dww_ref[d]                                    # (kk, Dp) depthwise taps
            bv = blkv_ref[d]                                    # (6, Dp) bias/BN vectors

            # depthwise 'same' conv: shift-matrix matmul per tap, accumulate
            acc = jnp.zeros_like(h)
            for t in range(kk):
                acc = acc + jnp.dot(shifts[t], h,
                                    preferred_element_type=jnp.float32) * dww[t:t + 1]
            y = jnp.maximum(acc + bv[0:1], 0.0) * bv[1:2] + bv[2:3]
            h = h + y                                           # Residual

            # pointwise 1x1 conv as matmul + bias + ReLU + BN
            z2 = jnp.dot(h, pww_ref[d], preferred_element_type=jnp.float32)
            h = jnp.maximum(z2 + bv[3:4], 0.0) * bv[4:5] + bv[5:6]

        # AdaptiveAvgPool2d((1,1)) + Flatten + Linear head (mean(h) @ W == mean(h @ W))
        logits = jnp.dot(h, whead_ref[...], preferred_element_type=jnp.float32)
        o_ref[0] = jnp.mean(logits, axis=0, keepdims=True) + bhead_ref[...]

    return kernel


def _dw_shift_matrices(Ho, Wo, ksize):
    """0/1 selection matrices implementing the 'same'-padded depthwise taps
    (and exact zero boundaries) on the flat (Ho*Wo, C) row layout."""
    r = ksize // 2
    R = Ho * Wo
    S = np.zeros((ksize * ksize, R, R), np.float32)
    for kh in range(ksize):
        for kw in range(ksize):
            t = kh * ksize + kw
            dh, dw = kh - r, kw - r
            for ho in range(Ho):
                for wo in range(Wo):
                    hs, ws = ho + dh, wo + dw
                    if 0 <= hs < Ho and 0 <= ws < Wo:
                        S[t, ho * Wo + wo, hs * Wo + ws] = 1.0
    return jnp.asarray(S)


# --------------------------------------------------------------------------
# Parameters (deterministic synthetic init, PyTorch-like shapes)
# --------------------------------------------------------------------------

def _init_bn(key, n):
    k1, k2, k3, k4 = jax.random.split(key, 4)
    return {
        "gamma": 1.0 + 0.1 * jax.random.normal(k1, (n,), jnp.float32),
        "beta": 0.1 * jax.random.normal(k2, (n,), jnp.float32),
        "mean": 0.05 * jax.random.normal(k3, (n,), jnp.float32),
        "var": 1.0 + 0.1 * jax.random.uniform(k4, (n,), jnp.float32),
    }


def _fold_bn(bn, eps):
    scale = bn["gamma"] / jnp.sqrt(bn["var"] + eps)
    shift = bn["beta"] - bn["mean"] * scale
    return scale, shift


def init_params(key, *, dim, depth, kernel_size, patch_size, in_chans, num_classes):
    n_keys = 6 + depth * 6 + 2
    keys = iter(jax.random.split(key, n_keys))

    def conv_init(k, shape, fan_in):
        bound = 1.0 / math.sqrt(fan_in)
        return jax.random.uniform(k, shape, jnp.float32, -bound, bound)

    c9 = 9 * in_chans
    params = {}
    # synthetic SSN projection (color_scale*x ++ pos_scale*coords -> 9 neighbor logits)
    params["ssn_proj"] = 0.5 * jax.random.normal(next(keys), (9, in_chans + 2), jnp.float32)

    fan_stem = c9 * patch_size * patch_size
    params["stem_w"] = conv_init(next(keys), (dim, c9, patch_size, patch_size), fan_stem)
    params["stem_b"] = conv_init(next(keys), (dim,), fan_stem)
    params["stem_bn"] = _init_bn(next(keys), dim)

    blocks = []
    for _ in range(depth):
        fan_dw = kernel_size * kernel_size  # groups=dim -> 1 input channel per group
        blocks.append({
            "dw_w": conv_init(next(keys), (dim, 1, kernel_size, kernel_size), fan_dw),
            "dw_b": conv_init(next(keys), (dim,), fan_dw),
            "bn1": _init_bn(next(keys), dim),
            "pw_w": conv_init(next(keys), (dim, dim, 1, 1), dim),
            "pw_b": conv_init(next(keys), (dim,), dim),
            "bn2": _init_bn(next(keys), dim),
        })
    params["blocks"] = blocks

    params["head_w"] = conv_init(next(keys), (num_classes, dim), dim)
    params["head_b"] = conv_init(next(keys), (num_classes,), dim)
    return params


# --------------------------------------------------------------------------
# Forward pass
# --------------------------------------------------------------------------

def convmixer_ssn_forward(x, params, *, dim, depth, kernel_size, patch_size,
                          pos_scale=2.5, color_scale=0.26, bn_eps=1e-5):
    B, C, H, W = x.shape
    assert H == 32 and W == 32, "ConvMixerSSN.forward_features hard-codes 32x32 CIFAR images"
    assert W % patch_size == 0, "patch size must divide 32"
    assert kernel_size % 2 == 1, "padding='same' path implemented for odd kernel sizes"

    P = patch_size
    Ho, Wo = H // P, W // P
    Rb = Ho * Wo                              # patch positions per image (rows)
    KK = kernel_size * kernel_size
    C9 = 9 * C
    K = C9 * P * P                            # im2col contraction length
    NC = params["head_w"].shape[0]
    Dp = ((dim + 127) // 128) * 128           # lane-dense channel width

    nspix = (H * W) // (P * P)
    nspix_axis = int(math.sqrt(nspix))
    assert nspix_axis * nspix_axis == nspix
    pscale = pos_scale * max(nspix_axis / H, nspix_axis / W)

    # ---- synthetic SSN attention (wrapper-side; fuses into one XLA producer) ----
    # TODO(synk): SSNModel source is not provided in the reference module; substitute a
    # deterministic softmax attention over the 9 neighbouring superpixels computed from
    # the same SSN inputs, with spixel size = image_size / sqrt(nspix).
    coords = jnp.stack(jnp.meshgrid(jnp.arange(H, dtype=jnp.float32),
                                    jnp.arange(W, dtype=jnp.float32), indexing="ij"), 0)
    coords = jnp.broadcast_to(coords[None], (B, 2, H, W))
    ssn_in = jnp.concatenate([color_scale * x, pscale * coords], axis=1)    # (B, C+2, H, W)
    att = jax.nn.softmax(jnp.einsum("kc,bchw->kbhw", params["ssn_proj"], ssn_in), axis=0)

    sh = H // nspix_axis
    sw = W // nspix_axis
    x_pad = jnp.pad(x, ((0, 0), (0, 0), (sh, sh), (sw, sw)))
    slices = [
        x_pad[:, :, 2 * sh:, 2 * sw:],            # br -> att[0]
        x_pad[:, :, 2 * sh:, sw:sw + W],          # bm -> att[1]
        x_pad[:, :, 2 * sh:, 0:W],                # bl -> att[2]
        x_pad[:, :, sh:sh + H, 2 * sw:],          # mr -> att[3]
        x_pad[:, :, sh:sh + H, sw:sw + W],        # mm -> att[4]
        x_pad[:, :, sh:sh + H, 0:W],              # ml -> att[5]
        x_pad[:, :, 0:H, 2 * sw:],                # tr -> att[6]
        x_pad[:, :, 0:H, sw:sw + W],              # tm -> att[7]
        x_pad[:, :, 0:H, 0:W],                    # tl -> att[8]
    ]
    attended = jnp.concatenate([s * att[k][:, None] for k, s in enumerate(slices)], axis=1)

    # im2col for the stride=kernel=patch stem conv; this is pure layout plumbing that
    # XLA fuses with the attention producer, so only the single (B, Rb, K) `patches`
    # array feeding the fused kernel is materialised in HBM.
    patches = (attended.reshape(B, C9, Ho, P, Wo, P)
               .transpose(0, 2, 4, 1, 3, 5)
               .reshape(B, Rb, K))

    # ---- fold eval-mode BN, pad every channel axis to Dp lanes (zeros are neutral) ----
    def pad_c(a):
        return jnp.pad(a, [(0, 0)] * (a.ndim - 1) + [(0, Dp - a.shape[-1])])

    s0, t0 = _fold_bn(params["stem_bn"], bn_eps)
    wstem = pad_c(params["stem_w"].reshape(dim, K).T)                  # (K, Dp)
    stem_vec = pad_c(jnp.stack([params["stem_b"], s0, t0]))            # (3, Dp)

    dw_w, pw_w, blk_vec = [], [], []
    for blk in params["blocks"]:
        s1, t1 = _fold_bn(blk["bn1"], bn_eps)
        s2, t2 = _fold_bn(blk["bn2"], bn_eps)
        dw_w.append(pad_c(blk["dw_w"].reshape(dim, KK).T))             # (KK, Dp)
        pw_w.append(jnp.pad(blk["pw_w"].reshape(dim, dim).T,
                            ((0, Dp - dim), (0, Dp - dim))))           # (Dp, Dp)
        blk_vec.append(pad_c(jnp.stack([blk["dw_b"], s1, t1,
                                        blk["pw_b"], s2, t2])))        # (6, Dp)
    dw_w = jnp.stack(dw_w)                                             # (depth, KK, Dp)
    pw_w = jnp.stack(pw_w)                                             # (depth, Dp, Dp)
    blk_vec = jnp.stack(blk_vec)                                       # (depth, 6, Dp)

    whead = jnp.pad(params["head_w"].T, ((0, Dp - dim), (0, 0)))       # (Dp, NC)
    bhead = params["head_b"][None, :]                                  # (1, NC)

    shifts = _dw_shift_matrices(Ho, Wo, kernel_size)                   # (KK, Rb, Rb), const

    kernel = _make_fused_kernel(depth, KK)
    out = pl.pallas_call(
        kernel,
        out_shape=jax.ShapeDtypeStruct((B, 1, NC), jnp.float32),
        grid=(B,),
        in_specs=[
            pl.BlockSpec((1, Rb, K), lambda b: (b, 0, 0)),             # per-batch rows
            pl.BlockSpec((K, Dp), lambda b: (0, 0)),                   # stem weight
            pl.BlockSpec((3, Dp), lambda b: (0, 0)),                   # stem bias/BN
            pl.BlockSpec((KK, Rb, Rb), lambda b: (0, 0, 0)),           # dw shift taps
            pl.BlockSpec((depth, KK, Dp), lambda b: (0, 0, 0)),        # dw weights
            pl.BlockSpec((depth, Dp, Dp), lambda b: (0, 0, 0)),        # pw weights
            pl.BlockSpec((depth, 6, Dp), lambda b: (0, 0, 0)),         # per-block vecs
            pl.BlockSpec((Dp, NC), lambda b: (0, 0)),                  # head weight
            pl.BlockSpec((1, NC), lambda b: (0, 0)),                   # head bias
        ],
        out_specs=pl.BlockSpec((1, 1, NC), lambda b: (b, 0, 0)),
        compiler_params=pltpu.CompilerParams(
            dimension_semantics=("parallel",),        # megacore split over batch on v7x
            vmem_limit_bytes=32 * 1024 * 1024,        # well within 64 MiB v7x VMEM
        ),
    )(patches, wstem, stem_vec, shifts, dw_w, pw_w, blk_vec, whead, bhead)

    return out.reshape(B, NC)


# --------------------------------------------------------------------------
# Demo
# --------------------------------------------------------------------------

if __name__ == "__main__":
    DIM, DEPTH, KSIZE, PATCH, IN_CHANS, NCLS = 32, 2, 3, 8, 3, 10
    key = jax.random.PRNGKey(0)
    kx, kp = jax.random.split(key)
    x = jax.random.normal(kx, (2, IN_CHANS, 32, 32), jnp.float32)   # NCHW like PyTorch
    params = init_params(kp, dim=DIM, depth=DEPTH, kernel_size=KSIZE,
                         patch_size=PATCH, in_chans=IN_CHANS, num_classes=NCLS)

    fwd = jax.jit(partial(convmixer_ssn_forward, dim=DIM, depth=DEPTH,
                          kernel_size=KSIZE, patch_size=PATCH))
    logits = fwd(x, params)
    jax.block_until_ready(logits)
    assert logits.shape == (2, NCLS) and logits.dtype == jnp.float32
    assert bool(jnp.all(jnp.isfinite(logits)))
    print("KERNEL_OK")
</pallas_src>

<mosaic_0001>
module attributes {stable_mosaic.version = 11 : i64} {
  func.func @kernel(%arg0: i32, %arg1: memref<1x16x1728xf32, #tpu.memory_space<vmem>>, %arg2: memref<1728x128xf32, #tpu.memory_space<vmem>>, %arg3: memref<3x128xf32, #tpu.memory_space<vmem>>, %arg4: memref<9x16x16xf32, #tpu.memory_space<vmem>>, %arg5: memref<2x9x128xf32, #tpu.memory_space<vmem>>, %arg6: memref<2x128x128xf32, #tpu.memory_space<vmem>>, %arg7: memref<2x6x128xf32, #tpu.memory_space<vmem>>, %arg8: memref<128x10xf32, #tpu.memory_space<vmem>>, %arg9: memref<1x10xf32, #tpu.memory_space<vmem>>, %arg10: memref<1x1x10xf32, #tpu.memory_space<vmem>>) attributes {dimension_semantics = [#tpu.dimension_semantics<parallel>], iteration_bounds = array<i64: 2>, scalar_prefetch = 0 : i64, scratch_operands = 0 : i64, tpu.core_type = #tpu.core_type<tc>, window_params = [{transform_indices = @transform_0, window_bounds = array<i64: 1, 16, 1728>}, {pipeline_mode = #tpu.pipeline_mode<synchronous>, transform_indices = @transform_1, window_bounds = array<i64: 1728, 128>}, {pipeline_mode = #tpu.pipeline_mode<synchronous>, transform_indices = @transform_2, window_bounds = array<i64: 3, 128>}, {pipeline_mode = #tpu.pipeline_mode<synchronous>, transform_indices = @transform_3, window_bounds = array<i64: 9, 16, 16>}, {pipeline_mode = #tpu.pipeline_mode<synchronous>, transform_indices = @transform_4, window_bounds = array<i64: 2, 9, 128>}, {pipeline_mode = #tpu.pipeline_mode<synchronous>, transform_indices = @transform_5, window_bounds = array<i64: 2, 128, 128>}, {pipeline_mode = #tpu.pipeline_mode<synchronous>, transform_indices = @transform_6, window_bounds = array<i64: 2, 6, 128>}, {pipeline_mode = #tpu.pipeline_mode<synchronous>, transform_indices = @transform_7, window_bounds = array<i64: 128, 10>}, {pipeline_mode = #tpu.pipeline_mode<synchronous>, transform_indices = @transform_8, window_bounds = array<i64: 1, 10>}, {transform_indices = @transform_9, window_bounds = array<i64: 1, 1, 10>}]} {
    %c0 = arith.constant 0 : index
    %c0_0 = arith.constant 0 : index
    %c0_1 = arith.constant 0 : index
    %0 = vector.load %arg1[%c0, %c0_0, %c0_1] : memref<1x16x1728xf32, #tpu.memory_space<vmem>>, vector<1x16x1728xf32>
    %1 = vector.shape_cast %0 : vector<1x16x1728xf32> to vector<16x1728xf32>
    %c0_2 = arith.constant 0 : index
    %c0_3 = arith.constant 0 : index
    %2 = vector.load %arg3[%c0_2, %c0_3] : memref<3x128xf32, #tpu.memory_space<vmem>>, vector<3x128xf32>
    %c0_4 = arith.constant 0 : index
    %c0_5 = arith.constant 0 : index
    %3 = vector.load %arg2[%c0_4, %c0_5] : memref<1728x128xf32, #tpu.memory_space<vmem>>, vector<1728x128xf32>
    %cst = arith.constant dense<0.000000e+00> : vector<16x128xf32>
    %4 = tpu.matmul %1, %3, %cst {dimension_numbers = #tpu.dot_dimension_numbers<[1], [0], [0], [1], [0, 0, 1, 1], [], []>} : vector<16x1728xf32>, vector<1728x128xf32>, vector<16x128xf32> -> vector<16x128xf32>
    %5 = vector.extract_strided_slice %2 {offsets = [0, 0], sizes = [1, 128], strides = [1, 1]} : vector<3x128xf32> to vector<1x128xf32>
    %6 = vector.broadcast %5 : vector<1x128xf32> to vector<16x128xf32>
    %7 = arith.addf %4, %6 : vector<16x128xf32>
    %cst_6 = arith.constant 0.000000e+00 : f32
    %8 = vector.broadcast %cst_6 : f32 to vector<16x128xf32>
    %9 = arith.maximumf %7, %8 : vector<16x128xf32>
    %10 = vector.extract_strided_slice %2 {offsets = [1, 0], sizes = [1, 128], strides = [1, 1]} : vector<3x128xf32> to vector<1x128xf32>
    %11 = vector.broadcast %10 : vector<1x128xf32> to vector<16x128xf32>
    %12 = arith.mulf %9, %11 : vector<16x128xf32>
    %13 = vector.extract_strided_slice %2 {offsets = [2, 0], sizes = [1, 128], strides = [1, 1]} : vector<3x128xf32> to vector<1x128xf32>
    %14 = vector.broadcast %13 : vector<1x128xf32> to vector<16x128xf32>
    %15 = arith.addf %12, %14 : vector<16x128xf32>
    %c0_7 = arith.constant 0 : index
    %c0_8 = arith.constant 0 : index
    %c0_9 = arith.constant 0 : index
    %16 = vector.load %arg4[%c0_7, %c0_8, %c0_9] : memref<9x16x16xf32, #tpu.memory_space<vmem>>, vector<9x16x16xf32>
    %c0_10 = arith.constant 0 : index
    %c0_11 = arith.constant 0 : index
    %c0_12 = arith.constant 0 : index
    %17 = vector.load %arg5[%c0_10, %c0_11, %c0_12] : memref<2x9x128xf32, #tpu.memory_space<vmem>>, vector<1x9x128xf32>
    %18 = vector.shape_cast %17 : vector<1x9x128xf32> to vector<9x128xf32>
    %c0_13 = arith.constant 0 : index
    %c0_14 = arith.constant 0 : index
    %c0_15 = arith.constant 0 : index
    %19 = vector.load %arg7[%c0_13, %c0_14, %c0_15] : memref<2x6x128xf32, #tpu.memory_space<vmem>>, vector<1x6x128xf32>
    %20 = vector.shape_cast %19 : vector<1x6x128xf32> to vector<6x128xf32>
    %cst_16 = arith.constant 0.000000e+00 : f32
    %21 = vector.broadcast %cst_16 : f32 to vector<16x128xf32>
    %22 = vector.extract_strided_slice %16 {offsets = [0, 0, 0], sizes = [1, 16, 16], strides = [1, 1, 1]} : vector<9x16x16xf32> to vector<1x16x16xf32>
    %23 = vector.shape_cast %22 : vector<1x16x16xf32> to vector<16x16xf32>
    %cst_17 = arith.constant dense<0.000000e+00> : vector<16x128xf32>
    %24 = tpu.matmul %23, %15, %cst_17 {dimension_numbers = #tpu.dot_dimension_numbers<[1], [0], [0], [1], [0, 0, 1, 1], [], []>} : vector<16x16xf32>, vector<16x128xf32>, vector<16x128xf32> -> vector<16x128xf32>
    %25 = vector.extract_strided_slice %18 {offsets = [0, 0], sizes = [1, 128], strides = [1, 1]} : vector<9x128xf32> to vector<1x128xf32>
    %26 = vector.broadcast %25 : vector<1x128xf32> to vector<16x128xf32>
    %27 = arith.mulf %24, %26 : vector<16x128xf32>
    %28 = arith.addf %21, %27 : vector<16x128xf32>
    %29 = vector.extract_strided_slice %16 {offsets = [1, 0, 0], sizes = [1, 16, 16], strides = [1, 1, 1]} : vector<9x16x16xf32> to vector<1x16x16xf32>
    %30 = vector.shape_cast %29 : vector<1x16x16xf32> to vector<16x16xf32>
    %cst_18 = arith.constant dense<0.000000e+00> : vector<16x128xf32>
    %31 = tpu.matmul %30, %15, %cst_18 {dimension_numbers = #tpu.dot_dimension_numbers<[1], [0], [0], [1], [0, 0, 1, 1], [], []>} : vector<16x16xf32>, vector<16x128xf32>, vector<16x128xf32> -> vector<16x128xf32>
    %32 = vector.extract_strided_slice %18 {offsets = [1, 0], sizes = [1, 128], strides = [1, 1]} : vector<9x128xf32> to vector<1x128xf32>
    %33 = vector.broadcast %32 : vector<1x128xf32> to vector<16x128xf32>
    %34 = arith.mulf %31, %33 : vector<16x128xf32>
    %35 = arith.addf %28, %34 : vector<16x128xf32>
    %36 = vector.extract_strided_slice %16 {offsets = [2, 0, 0], sizes = [1, 16, 16], strides = [1, 1, 1]} : vector<9x16x16xf32> to vector<1x16x16xf32>
    %37 = vector.shape_cast %36 : vector<1x16x16xf32> to vector<16x16xf32>
    %cst_19 = arith.constant dense<0.000000e+00> : vector<16x128xf32>
    %38 = tpu.matmul %37, %15, %cst_19 {dimension_numbers = #tpu.dot_dimension_numbers<[1], [0], [0], [1], [0, 0, 1, 1], [], []>} : vector<16x16xf32>, vector<16x128xf32>, vector<16x128xf32> -> vector<16x128xf32>
    %39 = vector.extract_strided_slice %18 {offsets = [2, 0], sizes = [1, 128], strides = [1, 1]} : vector<9x128xf32> to vector<1x128xf32>
    %40 = vector.broadcast %39 : vector<1x128xf32> to vector<16x128xf32>
    %41 = arith.mulf %38, %40 : vector<16x128xf32>
    %42 = arith.addf %35, %41 : vector<16x128xf32>
    %43 = vector.extract_strided_slice %16 {offsets = [3, 0, 0], sizes = [1, 16, 16], strides = [1, 1, 1]} : vector<9x16x16xf32> to vector<1x16x16xf32>
    %44 = vector.shape_cast %43 : vector<1x16x16xf32> to vector<16x16xf32>
    %cst_20 = arith.constant dense<0.000000e+00> : vector<16x128xf32>
    %45 = tpu.matmul %44, %15, %cst_20 {dimension_numbers = #tpu.dot_dimension_numbers<[1], [0], [0], [1], [0, 0, 1, 1], [], []>} : vector<16x16xf32>, vector<16x128xf32>, vector<16x128xf32> -> vector<16x128xf32>
    %46 = vector.extract_strided_slice %18 {offsets = [3, 0], sizes = [1, 128], strides = [1, 1]} : vector<9x128xf32> to vector<1x128xf32>
    %47 = vector.broadcast %46 : vector<1x128xf32> to vector<16x128xf32>
    %48 = arith.mulf %45, %47 : vector<16x128xf32>
    %49 = arith.addf %42, %48 : vector<16x128xf32>
    %50 = vector.extract_strided_slice %16 {offsets = [4, 0, 0], sizes = [1, 16, 16], strides = [1, 1, 1]} : vector<9x16x16xf32> to vector<1x16x16xf32>
    %51 = vector.shape_cast %50 : vector<1x16x16xf32> to vector<16x16xf32>
    %cst_21 = arith.constant dense<0.000000e+00> : vector<16x128xf32>
    %52 = tpu.matmul %51, %15, %cst_21 {dimension_numbers = #tpu.dot_dimension_numbers<[1], [0], [0], [1], [0, 0, 1, 1], [], []>} : vector<16x16xf32>, vector<16x128xf32>, vector<16x128xf32> -> vector<16x128xf32>
    %53 = vector.extract_strided_slice %18 {offsets = [4, 0], sizes = [1, 128], strides = [1, 1]} : vector<9x128xf32> to vector<1x128xf32>
    %54 = vector.broadcast %53 : vector<1x128xf32> to vector<16x128xf32>
    %55 = arith.mulf %52, %54 : vector<16x128xf32>
    %56 = arith.addf %49, %55 : vector<16x128xf32>
    %57 = vector.extract_strided_slice %16 {offsets = [5, 0, 0], sizes = [1, 16, 16], strides = [1, 1, 1]} : vector<9x16x16xf32> to vector<1x16x16xf32>
    %58 = vector.shape_cast %57 : vector<1x16x16xf32> to vector<16x16xf32>
    %cst_22 = arith.constant dense<0.000000e+00> : vector<16x128xf32>
    %59 = tpu.matmul %58, %15, %cst_22 {dimension_numbers = #tpu.dot_dimension_numbers<[1], [0], [0], [1], [0, 0, 1, 1], [], []>} : vector<16x16xf32>, vector<16x128xf32>, vector<16x128xf32> -> vector<16x128xf32>
    %60 = vector.extract_strided_slice %18 {offsets = [5, 0], sizes = [1, 128], strides = [1, 1]} : vector<9x128xf32> to vector<1x128xf32>
    %61 = vector.broadcast %60 : vector<1x128xf32> to vector<16x128xf32>
    %62 = arith.mulf %59, %61 : vector<16x128xf32>
    %63 = arith.addf %56, %62 : vector<16x128xf32>
    %64 = vector.extract_strided_slice %16 {offsets = [6, 0, 0], sizes = [1, 16, 16], strides = [1, 1, 1]} : vector<9x16x16xf32> to vector<1x16x16xf32>
    %65 = vector.shape_cast %64 : vector<1x16x16xf32> to vector<16x16xf32>
    %cst_23 = arith.constant dense<0.000000e+00> : vector<16x128xf32>
    %66 = tpu.matmul %65, %15, %cst_23 {dimension_numbers = #tpu.dot_dimension_numbers<[1], [0], [0], [1], [0, 0, 1, 1], [], []>} : vector<16x16xf32>, vector<16x128xf32>, vector<16x128xf32> -> vector<16x128xf32>
    %67 = vector.extract_strided_slice %18 {offsets = [6, 0], sizes = [1, 128], strides = [1, 1]} : vector<9x128xf32> to vector<1x128xf32>
    %68 = vector.broadcast %67 : vector<1x128xf32> to vector<16x128xf32>
    %69 = arith.mulf %66, %68 : vector<16x128xf32>
    %70 = arith.addf %63, %69 : vector<16x128xf32>
    %71 = vector.extract_strided_slice %16 {offsets = [7, 0, 0], sizes = [1, 16, 16], strides = [1, 1, 1]} : vector<9x16x16xf32> to vector<1x16x16xf32>
    %72 = vector.shape_cast %71 : vector<1x16x16xf32> to vector<16x16xf32>
    %cst_24 = arith.constant dense<0.000000e+00> : vector<16x128xf32>
    %73 = tpu.matmul %72, %15, %cst_24 {dimension_numbers = #tpu.dot_dimension_numbers<[1], [0], [0], [1], [0, 0, 1, 1], [], []>} : vector<16x16xf32>, vector<16x128xf32>, vector<16x128xf32> -> vector<16x128xf32>
    %74 = vector.extract_strided_slice %18 {offsets = [7, 0], sizes = [1, 128], strides = [1, 1]} : vector<9x128xf32> to vector<1x128xf32>
    %75 = vector.broadcast %74 : vector<1x128xf32> to vector<16x128xf32>
    %76 = arith.mulf %73, %75 : vector<16x128xf32>
    %77 = arith.addf %70, %76 : vector<16x128xf32>
    %78 = vector.extract_strided_slice %16 {offsets = [8, 0, 0], sizes = [1, 16, 16], strides = [1, 1, 1]} : vector<9x16x16xf32> to vector<1x16x16xf32>
    %79 = vector.shape_cast %78 : vector<1x16x16xf32> to vector<16x16xf32>
    %cst_25 = arith.constant dense<0.000000e+00> : vector<16x128xf32>
    %80 = tpu.matmul %79, %15, %cst_25 {dimension_numbers = #tpu.dot_dimension_numbers<[1], [0], [0], [1], [0, 0, 1, 1], [], []>} : vector<16x16xf32>, vector<16x128xf32>, vector<16x128xf32> -> vector<16x128xf32>
    %81 = vector.extract_strided_slice %18 {offsets = [8, 0], sizes = [1, 128], strides = [1, 1]} : vector<9x128xf32> to vector<1x128xf32>
    %82 = vector.broadcast %81 : vector<1x128xf32> to vector<16x128xf32>
    %83 = arith.mulf %80, %82 : vector<16x128xf32>
    %84 = arith.addf %77, %83 : vector<16x128xf32>
    %85 = vector.extract_strided_slice %20 {offsets = [0, 0], sizes = [1, 128], strides = [1, 1]} : vector<6x128xf32> to vector<1x128xf32>
    %86 = vector.broadcast %85 : vector<1x128xf32> to vector<16x128xf32>
    %87 = arith.addf %84, %86 : vector<16x128xf32>
    %cst_26 = arith.constant 0.000000e+00 : f32
    %88 = vector.broadcast %cst_26 : f32 to vector<16x128xf32>
    %89 = arith.maximumf %87, %88 : vector<16x128xf32>
    %90 = vector.extract_strided_slice %20 {offsets = [1, 0], sizes = [1, 128], strides = [1, 1]} : vector<6x128xf32> to vector<1x128xf32>
    %91 = vector.broadcast %90 : vector<1x128xf32> to vector<16x128xf32>
    %92 = arith.mulf %89, %91 : vector<16x128xf32>
    %93 = vector.extract_strided_slice %20 {offsets = [2, 0], sizes = [1, 128], strides = [1, 1]} : vector<6x128xf32> to vector<1x128xf32>
    %94 = vector.broadcast %93 : vector<1x128xf32> to vector<16x128xf32>
    %95 = arith.addf %92, %94 : vector<16x128xf32>
    %96 = arith.addf %15, %95 : vector<16x128xf32>
    %c0_27 = arith.constant 0 : index
    %c0_28 = arith.constant 0 : index
    %c0_29 = arith.constant 0 : index
    %97 = vector.load %arg6[%c0_27, %c0_28, %c0_29] : memref<2x128x128xf32, #tpu.memory_space<vmem>>, vector<1x128x128xf32>
    %98 = vector.shape_cast %97 : vector<1x128x128xf32> to vector<128x128xf32>
    %cst_30 = arith.constant dense<0.000000e+00> : vector<16x128xf32>
    %99 = tpu.matmul %96, %98, %cst_30 {dimension_numbers = #tpu.dot_dimension_numbers<[1], [0], [0], [1], [0, 0, 1, 1], [], []>} : vector<16x128xf32>, vector<128x128xf32>, vector<16x128xf32> -> vector<16x128xf32>
    %100 = vector.extract_strided_slice %20 {offsets = [3, 0], sizes = [1, 128], strides = [1, 1]} : vector<6x128xf32> to vector<1x128xf32>
    %101 = vector.broadcast %100 : vector<1x128xf32> to vector<16x128xf32>
    %102 = arith.addf %99, %101 : vector<16x128xf32>
    %cst_31 = arith.constant 0.000000e+00 : f32
    %103 = vector.broadcast %cst_31 : f32 to vector<16x128xf32>
    %104 = arith.maximumf %102, %103 : vector<16x128xf32>
    %105 = vector.extract_strided_slice %20 {offsets = [4, 0], sizes = [1, 128], strides = [1, 1]} : vector<6x128xf32> to vector<1x128xf32>
    %106 = vector.broadcast %105 : vector<1x128xf32> to vector<16x128xf32>
    %107 = arith.mulf %104, %106 : vector<16x128xf32>
    %108 = vector.extract_strided_slice %20 {offsets = [5, 0], sizes = [1, 128], strides = [1, 1]} : vector<6x128xf32> to vector<1x128xf32>
    %109 = vector.broadcast %108 : vector<1x128xf32> to vector<16x128xf32>
    %110 = arith.addf %107, %109 : vector<16x128xf32>
    %c1 = arith.constant 1 : index
    %c0_32 = arith.constant 0 : index
    %c0_33 = arith.constant 0 : index
    %111 = vector.load %arg5[%c1, %c0_32, %c0_33] : memref<2x9x128xf32, #tpu.memory_space<vmem>>, vector<1x9x128xf32>
    %112 = vector.shape_cast %111 : vector<1x9x128xf32> to vector<9x128xf32>
    %c1_34 = arith.constant 1 : index
    %c0_35 = arith.constant 0 : index
    %c0_36 = arith.constant 0 : index
    %113 = vector.load %arg7[%c1_34, %c0_35, %c0_36] : memref<2x6x128xf32, #tpu.memory_space<vmem>>, vector<1x6x128xf32>
    %114 = vector.shape_cast %113 : vector<1x6x128xf32> to vector<6x128xf32>
    %cst_37 = arith.constant 0.000000e+00 : f32
    %115 = vector.broadcast %cst_37 : f32 to vector<16x128xf32>
    %116 = vector.extract_strided_slice %16 {offsets = [0, 0, 0], sizes = [1, 16, 16], strides = [1, 1, 1]} : vector<9x16x16xf32> to vector<1x16x16xf32>
    %117 = vector.shape_cast %116 : vector<1x16x16xf32> to vector<16x16xf32>
    %cst_38 = arith.constant dense<0.000000e+00> : vector<16x128xf32>
    %118 = tpu.matmul %117, %110, %cst_38 {dimension_numbers = #tpu.dot_dimension_numbers<[1], [0], [0], [1], [0, 0, 1, 1], [], []>} : vector<16x16xf32>, vector<16x128xf32>, vector<16x128xf32> -> vector<16x128xf32>
    %119 = vector.extract_strided_slice %112 {offsets = [0, 0], sizes = [1, 128], strides = [1, 1]} : vector<9x128xf32> to vector<1x128xf32>
    %120 = vector.broadcast %119 : vector<1x128xf32> to vector<16x128xf32>
    %121 = arith.mulf %118, %120 : vector<16x128xf32>
    %122 = arith.addf %115, %121 : vector<16x128xf32>
    %123 = vector.extract_strided_slice %16 {offsets = [1, 0, 0], sizes = [1, 16, 16], strides = [1, 1, 1]} : vector<9x16x16xf32> to vector<1x16x16xf32>
    %124 = vector.shape_cast %123 : vector<1x16x16xf32> to vector<16x16xf32>
    %cst_39 = arith.constant dense<0.000000e+00> : vector<16x128xf32>
    %125 = tpu.matmul %124, %110, %cst_39 {dimension_numbers = #tpu.dot_dimension_numbers<[1], [0], [0], [1], [0, 0, 1, 1], [], []>} : vector<16x16xf32>, vector<16x128xf32>, vector<16x128xf32> -> vector<16x128xf32>
    %126 = vector.extract_strided_slice %112 {offsets = [1, 0], sizes = [1, 128], strides = [1, 1]} : vector<9x128xf32> to vector<1x128xf32>
    %127 = vector.broadcast %126 : vector<1x128xf32> to vector<16x128xf32>
    %128 = arith.mulf %125, %127 : vector<16x128xf32>
    %129 = arith.addf %122, %128 : vector<16x128xf32>
    %130 = vector.extract_strided_slice %16 {offsets = [2, 0, 0], sizes = [1, 16, 16], strides = [1, 1, 1]} : vector<9x16x16xf32> to vector<1x16x16xf32>
    %131 = vector.shape_cast %130 : vector<1x16x16xf32> to vector<16x16xf32>
    %cst_40 = arith.constant dense<0.000000e+00> : vector<16x128xf32>
    %132 = tpu.matmul %131, %110, %cst_40 {dimension_numbers = #tpu.dot_dimension_numbers<[1], [0], [0], [1], [0, 0, 1, 1], [], []>} : vector<16x16xf32>, vector<16x128xf32>, vector<16x128xf32> -> vector<16x128xf32>
    %133 = vector.extract_strided_slice %112 {offsets = [2, 0], sizes = [1, 128], strides = [1, 1]} : vector<9x128xf32> to vector<1x128xf32>
    %134 = vector.broadcast %133 : vector<1x128xf32> to vector<16x128xf32>
    %135 = arith.mulf %132, %134 : vector<16x128xf32>
    %136 = arith.addf %129, %135 : vector<16x128xf32>
    %137 = vector.extract_strided_slice %16 {offsets = [3, 0, 0], sizes = [1, 16, 16], strides = [1, 1, 1]} : vector<9x16x16xf32> to vector<1x16x16xf32>
    %138 = vector.shape_cast %137 : vector<1x16x16xf32> to vector<16x16xf32>
    %cst_41 = arith.constant dense<0.000000e+00> : vector<16x128xf32>
    %139 = tpu.matmul %138, %110, %cst_41 {dimension_numbers = #tpu.dot_dimension_numbers<[1], [0], [0], [1], [0, 0, 1, 1], [], []>} : vector<16x16xf32>, vector<16x128xf32>, vector<16x128xf32> -> vector<16x128xf32>
    %140 = vector.extract_strided_slice %112 {offsets = [3, 0], sizes = [1, 128], strides = [1, 1]} : vector<9x128xf32> to vector<1x128xf32>
    %141 = vector.broadcast %140 : vector<1x128xf32> to vector<16x128xf32>
    %142 = arith.mulf %139, %141 : vector<16x128xf32>
    %143 = arith.addf %136, %142 : vector<16x128xf32>
    %144 = vector.extract_strided_slice %16 {offsets = [4, 0, 0], sizes = [1, 16, 16], strides = [1, 1, 1]} : vector<9x16x16xf32> to vector<1x16x16xf32>
    %145 = vector.shape_cast %144 : vector<1x16x16xf32> to vector<16x16xf32>
    %cst_42 = arith.constant dense<0.000000e+00> : vector<16x128xf32>
    %146 = tpu.matmul %145, %110, %cst_42 {dimension_numbers = #tpu.dot_dimension_numbers<[1], [0], [0], [1], [0, 0, 1, 1], [], []>} : vector<16x16xf32>, vector<16x128xf32>, vector<16x128xf32> -> vector<16x128xf32>
    %147 = vector.extract_strided_slice %112 {offsets = [4, 0], sizes = [1, 128], strides = [1, 1]} : vector<9x128xf32> to vector<1x128xf32>
    %148 = vector.broadcast %147 : vector<1x128xf32> to vector<16x128xf32>
    %149 = arith.mulf %146, %148 : vector<16x128xf32>
    %150 = arith.addf %143, %149 : vector<16x128xf32>
    %151 = vector.extract_strided_slice %16 {offsets = [5, 0, 0], sizes = [1, 16, 16], strides = [1, 1, 1]} : vector<9x16x16xf32> to vector<1x16x16xf32>
    %152 = vector.shape_cast %151 : vector<1x16x16xf32> to vector<16x16xf32>
    %cst_43 = arith.constant dense<0.000000e+00> : vector<16x128xf32>
    %153 = tpu.matmul %152, %110, %cst_43 {dimension_numbers = #tpu.dot_dimension_numbers<[1], [0], [0], [1], [0, 0, 1, 1], [], []>} : vector<16x16xf32>, vector<16x128xf32>, vector<16x128xf32> -> vector<16x128xf32>
    %154 = vector.extract_strided_slice %112 {offsets = [5, 0], sizes = [1, 128], strides = [1, 1]} : vector<9x128xf32> to vector<1x128xf32>
    %155 = vector.broadcast %154 : vector<1x128xf32> to vector<16x128xf32>
    %156 = arith.mulf %153, %155 : vector<16x128xf32>
    %157 = arith.addf %150, %156 : vector<16x128xf32>
    %158 = vector.extract_strided_slice %16 {offsets = [6, 0, 0], sizes = [1, 16, 16], strides = [1, 1, 1]} : vector<9x16x16xf32> to vector<1x16x16xf32>
    %159 = vector.shape_cast %158 : vector<1x16x16xf32> to vector<16x16xf32>
    %cst_44 = arith.constant dense<0.000000e+00> : vector<16x128xf32>
    %160 = tpu.matmul %159, %110, %cst_44 {dimension_numbers = #tpu.dot_dimension_numbers<[1], [0], [0], [1], [0, 0, 1, 1], [], []>} : vector<16x16xf32>, vector<16x128xf32>, vector<16x128xf32> -> vector<16x128xf32>
    %161 = vector.extract_strided_slice %112 {offsets = [6, 0], sizes = [1, 128], strides = [1, 1]} : vector<9x128xf32> to vector<1x128xf32>
    %162 = vector.broadcast %161 : vector<1x128xf32> to vector<16x128xf32>
    %163 = arith.mulf %160, %162 : vector<16x128xf32>
    %164 = arith.addf %157, %163 : vector<16x128xf32>
    %165 = vector.extract_strided_slice %16 {offsets = [7, 0, 0], sizes = [1, 16, 16], strides = [1, 1, 1]} : vector<9x16x16xf32> to vector<1x16x16xf32>
    %166 = vector.shape_cast %165 : vector<1x16x16xf32> to vector<16x16xf32>
    %cst_45 = arith.constant dense<0.000000e+00> : vector<16x128xf32>
    %167 = tpu.matmul %166, %110, %cst_45 {dimension_numbers = #tpu.dot_dimension_numbers<[1], [0], [0], [1], [0, 0, 1, 1], [], []>} : vector<16x16xf32>, vector<16x128xf32>, vector<16x128xf32> -> vector<16x128xf32>
    %168 = vector.extract_strided_slice %112 {offsets = [7, 0], sizes = [1, 128], strides = [1, 1]} : vector<9x128xf32> to vector<1x128xf32>
    %169 = vector.broadcast %168 : vector<1x128xf32> to vector<16x128xf32>
    %170 = arith.mulf %167, %169 : vector<16x128xf32>
    %171 = arith.addf %164, %170 : vector<16x128xf32>
    %172 = vector.extract_strided_slice %16 {offsets = [8, 0, 0], sizes = [1, 16, 16], strides = [1, 1, 1]} : vector<9x16x16xf32> to vector<1x16x16xf32>
    %173 = vector.shape_cast %172 : vector<1x16x16xf32> to vector<16x16xf32>
    %cst_46 = arith.constant dense<0.000000e+00> : vector<16x128xf32>
    %174 = tpu.matmul %173, %110, %cst_46 {dimension_numbers = #tpu.dot_dimension_numbers<[1], [0], [0], [1], [0, 0, 1, 1], [], []>} : vector<16x16xf32>, vector<16x128xf32>, vector<16x128xf32> -> vector<16x128xf32>
    %175 = vector.extract_strided_slice %112 {offsets = [8, 0], sizes = [1, 128], strides = [1, 1]} : vector<9x128xf32> to vector<1x128xf32>
    %176 = vector.broadcast %175 : vector<1x128xf32> to vector<16x128xf32>
    %177 = arith.mulf %174, %176 : vector<16x128xf32>
    %178 = arith.addf %171, %177 : vector<16x128xf32>
    %179 = vector.extract_strided_slice %114 {offsets = [0, 0], sizes = [1, 128], strides = [1, 1]} : vector<6x128xf32> to vector<1x128xf32>
    %180 = vector.broadcast %179 : vector<1x128xf32> to vector<16x128xf32>
    %181 = arith.addf %178, %180 : vector<16x128xf32>
    %cst_47 = arith.constant 0.000000e+00 : f32
    %182 = vector.broadcast %cst_47 : f32 to vector<16x128xf32>
    %183 = arith.maximumf %181, %182 : vector<16x128xf32>
    %184 = vector.extract_strided_slice %114 {offsets = [1, 0], sizes = [1, 128], strides = [1, 1]} : vector<6x128xf32> to vector<1x128xf32>
    %185 = vector.broadcast %184 : vector<1x128xf32> to vector<16x128xf32>
    %186 = arith.mulf %183, %185 : vector<16x128xf32>
    %187 = vector.extract_strided_slice %114 {offsets = [2, 0], sizes = [1, 128], strides = [1, 1]} : vector<6x128xf32> to vector<1x128xf32>
    %188 = vector.broadcast %187 : vector<1x128xf32> to vector<16x128xf32>
    %189 = arith.addf %186, %188 : vector<16x128xf32>
    %190 = arith.addf %110, %189 : vector<16x128xf32>
    %c1_48 = arith.constant 1 : index
    %c0_49 = arith.constant 0 : index
    %c0_50 = arith.constant 0 : index
    %191 = vector.load %arg6[%c1_48, %c0_49, %c0_50] : memref<2x128x128xf32, #tpu.memory_space<vmem>>, vector<1x128x128xf32>
    %192 = vector.shape_cast %191 : vector<1x128x128xf32> to vector<128x128xf32>
    %cst_51 = arith.constant dense<0.000000e+00> : vector<16x128xf32>
    %193 = tpu.matmul %190, %192, %cst_51 {dimension_numbers = #tpu.dot_dimension_numbers<[1], [0], [0], [1], [0, 0, 1, 1], [], []>} : vector<16x128xf32>, vector<128x128xf32>, vector<16x128xf32> -> vector<16x128xf32>
    %194 = vector.extract_strided_slice %114 {offsets = [3, 0], sizes = [1, 128], strides = [1, 1]} : vector<6x128xf32> to vector<1x128xf32>
    %195 = vector.broadcast %194 : vector<1x128xf32> to vector<16x128xf32>
    %196 = arith.addf %193, %195 : vector<16x128xf32>
    %cst_52 = arith.constant 0.000000e+00 : f32
    %197 = vector.broadcast %cst_52 : f32 to vector<16x128xf32>
    %198 = arith.maximumf %196, %197 : vector<16x128xf32>
    %199 = vector.extract_strided_slice %114 {offsets = [4, 0], sizes = [1, 128], strides = [1, 1]} : vector<6x128xf32> to vector<1x128xf32>
    %200 = vector.broadcast %199 : vector<1x128xf32> to vector<16x128xf32>
    %201 = arith.mulf %198, %200 : vector<16x128xf32>
    %202 = vector.extract_strided_slice %114 {offsets = [5, 0], sizes = [1, 128], strides = [1, 1]} : vector<6x128xf32> to vector<1x128xf32>
    %203 = vector.broadcast %202 : vector<1x128xf32> to vector<16x128xf32>
    %204 = arith.addf %201, %203 : vector<16x128xf32>
    %c0_53 = arith.constant 0 : index
    %c0_54 = arith.constant 0 : index
    %205 = vector.load %arg8[%c0_53, %c0_54] : memref<128x10xf32, #tpu.memory_space<vmem>>, vector<128x10xf32>
    %cst_55 = arith.constant dense<0.000000e+00> : vector<16x10xf32>
    %206 = tpu.matmul %204, %205, %cst_55 {dimension_numbers = #tpu.dot_dimension_numbers<[1], [0], [0], [1], [0, 0, 1, 1], [], []>} : vector<16x128xf32>, vector<128x10xf32>, vector<16x10xf32> -> vector<16x10xf32>
    %cst_56 = arith.constant dense<0.000000e+00> : vector<10xf32>
    %207 = vector.multi_reduction <add>, %206, %cst_56 [0] : vector<16x10xf32> to vector<10xf32>
    %208 = vector.shape_cast %207 : vector<10xf32> to vector<1x10xf32>
    %cst_57 = arith.constant 1.600000e+01 : f32
    %209 = vector.broadcast %cst_57 : f32 to vector<1x10xf32>
    %210 = arith.divf %208, %209 : vector<1x10xf32>
    %c0_58 = arith.constant 0 : index
    %c0_59 = arith.constant 0 : index
    %211 = vector.load %arg9[%c0_58, %c0_59] : memref<1x10xf32, #tpu.memory_space<vmem>>, vector<1x10xf32>
    %212 = arith.addf %210, %211 : vector<1x10xf32>
    %c0_60 = arith.constant 0 : index
    %c0_61 = arith.constant 0 : index
    %c0_62 = arith.constant 0 : index
    %213 = vector.load %arg10[%c0_60, %c0_61, %c0_62] : memref<1x1x10xf32, #tpu.memory_space<vmem>>, vector<1x1x10xf32>
    %214 = vector.shape_cast %213 : vector<1x1x10xf32> to vector<1x10xf32>
    %215 = vector.shape_cast %212 : vector<1x10xf32> to vector<1x1x10xf32>
    tpu.vector_store %arg10[%c0_60, %c0_61, %c0_62], %215 {strides = array<i32>} : memref<1x1x10xf32, #tpu.memory_space<vmem>>, vector<1x1x10xf32>,
    return
  }
  func.func @transform_0(%arg0: i32) -> (i32, i32, i32) {
    %c0_i32 = arith.constant 0 : i32
    %c0_i32_0 = arith.constant 0 : i32
    %c0_i32_1 = arith.constant 0 : i32
    return %arg0, %c0_i32, %c0_i32_0 : i32, i32, i32
  }
  func.func @transform_1(%arg0: i32) -> (i32, i32) {
    %c0_i32 = arith.constant 0 : i32
    %c0_i32_0 = arith.constant 0 : i32
    %c0_i32_1 = arith.constant 0 : i32
    return %c0_i32, %c0_i32_0 : i32, i32
  }
  func.func @transform_2(%arg0: i32) -> (i32, i32) {
    %c0_i32 = arith.constant 0 : i32
    %c0_i32_0 = arith.constant 0 : i32
    %c0_i32_1 = arith.constant 0 : i32
    return %c0_i32, %c0_i32_0 : i32, i32
  }
  func.func @transform_3(%arg0: i32) -> (i32, i32, i32) {
    %c0_i32 = arith.constant 0 : i32
    %c0_i32_0 = arith.constant 0 : i32
    %c0_i32_1 = arith.constant 0 : i32
    %c0_i32_2 = arith.constant 0 : i32
    return %c0_i32, %c0_i32_0, %c0_i32_1 : i32, i32, i32
  }
  func.func @transform_4(%arg0: i32) -> (i32, i32, i32) {
    %c0_i32 = arith.constant 0 : i32
    %c0_i32_0 = arith.constant 0 : i32
    %c0_i32_1 = arith.constant 0 : i32
    %c0_i32_2 = arith.constant 0 : i32
    return %c0_i32, %c0_i32_0, %c0_i32_1 : i32, i32, i32
  }
  func.func @transform_5(%arg0: i32) -> (i32, i32, i32) {
    %c0_i32 = arith.constant 0 : i32
    %c0_i32_0 = arith.constant 0 : i32
    %c0_i32_1 = arith.constant 0 : i32
    %c0_i32_2 = arith.constant 0 : i32
    return %c0_i32, %c0_i32_0, %c0_i32_1 : i32, i32, i32
  }
  func.func @transform_6(%arg0: i32) -> (i32, i32, i32) {
    %c0_i32 = arith.constant 0 : i32
    %c0_i32_0 = arith.constant 0 : i32
    %c0_i32_1 = arith.constant 0 : i32
    %c0_i32_2 = arith.constant 0 : i32
    return %c0_i32, %c0_i32_0, %c0_i32_1 : i32, i32, i32
  }
  func.func @transform_7(%arg0: i32) -> (i32, i32) {
    %c0_i32 = arith.constant 0 : i32
    %c0_i32_0 = arith.constant 0 : i32
    %c0_i32_1 = arith.constant 0 : i32
    return %c0_i32, %c0_i32_0 : i32, i32
  }
  func.func @transform_8(%arg0: i32) -> (i32, i32) {
    %c0_i32 = arith.constant 0 : i32
    %c0_i32_0 = arith.constant 0 : i32
    %c0_i32_1 = arith.constant 0 : i32
    return %c0_i32, %c0_i32_0 : i32, i32
  }
  func.func @transform_9(%arg0: i32) -> (i32, i32, i32) {
    %c0_i32 = arith.constant 0 : i32
    %c0_i32_0 = arith.constant 0 : i32
    %c0_i32_1 = arith.constant 0 : i32
    return %arg0, %c0_i32, %c0_i32_0 : i32, i32, i32
  }
}

</mosaic_0001>

<bundles_post_ra>
// kernel: convmixer_ssn_forward.1
= control target key start
LH: loop header
LB: loop body
LE: loop exit
PB: predicated region body
PF: predicated region fallthrough
CT: control target
= control target key end

     0   :  { %14 = vsyncpa [#allocation3], 0  ;;  %s5208_s0 = inlined_call_operand.vmem [shape: f32[2,16,1728], index: 0, kind: input, shape index: {}]   ;;  %s5209_s1 = inlined_call_operand.vmem [shape: f32[1728,128], index: 1, kind: input, shape index: {}]   ;;  %s5210_s2 = inlined_call_operand.vmem [shape: f32[3,128], index: 2, kind: input, shape index: {}]   ;;  %s5211_s3 = inlined_call_operand.vmem [shape: f32[9,16,16], index: 3, kind: input, shape index: {}]   ;;  %s5212_s4 = inlined_call_operand.vmem [shape: f32[2,9,128], index: 4, kind: input, shape index: {}]   ;;  %s5213_s5 = inlined_call_operand.vmem [shape: f32[2,128,128], index: 5, kind: input, shape index: {}]   ;;  %s5214_s6 = inlined_call_operand.vmem [shape: f32[2,6,128], index: 6, kind: input, shape index: {}]   ;;  %s5215_s7 = inlined_call_operand.vmem [shape: f32[128,10], index: 7, kind: input, shape index: {}]   ;;  %s5216_s8 = inlined_call_operand.vmem [shape: f32[1,10], index: 8, kind: input, shape index: {}]   ;;  %s5217_s9 = inlined_call_operand.hbm [shape: f32[2,1,10], index: 9, kind: output, shape index: {}]  }
   0x1   :  { %16 = vsyncpa [#allocation3 + $0x1], 0  ;;  %s3945_s30 = smov 0   ;;  %s3947_s10 = smov 0  }
   0x2   :  { %s3949_s11 = smov 0   ;;  %s3951_s12 = smov 0  }
   0x3 LB: > { %s3966_s13 = sadd.s32 4294967295, %s3891_s12   ;;  %s3138_s14 = sadd.s32 4294967294, %s3891_s12   ;;  %s3891_s12 = sphi %s3951_s12, %s5223_s12   ;;  %s3887_s11 = sphi %s3949_s11, %s5222_s11   ;;  %s3883_s10 = sphi %s3947_s10, %s5221_s10   ;;  %s3879_s30 = sphi %s3945_s30, %s5220_s30  }
   0x4   : > { %s3970_s15 = sadd.s32 1, %s3891_s12   ;;  %s223_s16 = sadd.s32 1, %s3887_s11 }
   0x5   : > { %s220_s17 = ssub.s32 %s3891_s12, %s3970_s15  ;;  %p233_p0 = scmp.ne.s32.totalorder %s3887_s11, %s3883_s10 }
   0x6   : > { %p221_p1 = scmp.eq.s32.totalorder %s220_s17, 0  ;;  %p234_p2 = scmp.eq.s32.totalorder %s3966_s13, 1 }
   0x7   : > { %p239_p3 = scmp.ne.s32.totalorder %s3883_s10, %s3879_s30  ;;  %p240_p4 = scmp.eq.s32.totalorder %s3138_s14, 1 }
   0x8   : > { %s3981_s18 = scalar_select %p221_p1, %s3887_s11, %s223_s16  }
   0x9   : > { %p3983_p5 = por %p234_p2, %p233_p0  ;;  %p3987_p6 = por %p240_p4, %p239_p3 }
   0xa   : > { %p3141_p7 = scmp.ge.s32.totalorder %s3891_s12, 1  ;;  %p290_p8 = scmp.lt.s32.totalorder %s3891_s12, 3 }
   0xc   : > { %p291_p9 = pnand %p3141_p7, %p290_p8 }
   0xd   : > { %p325_p10 = scmp.lt.s32.totalorder (!%p291_p9), %s3966_s13, 1  ;;  %s3202_s25 = sshll.u32 (!%p291_p9), %s3966_s13, 4 }
   0xe   : > { %294 = sbr.rel (%p291_p9) target bundleno = 1499 (0x5db), region = 56  ;;  %s3081_s16 = scalar_lea.hbm (!%p291_p9), %s5217_s9, %s3202_s25 }
   0xf   : > { %s3894_s23 = smov (!%p291_p9), [#allocation2]  }
  0x10   : > { %s3835_s24 = sshll.u32 (!%p291_p9), %s3894_s23, 4  ;;  %s3836_s24 = int_to_ptr.vmem [resolvable:$false] %s3835_s24 }
  0x13   : > { %v390_v0 = vld [vmem:[%s5209_s1 + $0xf8] sm:$0xff]  ;;  %v389_v2 = vld [vmem:[%s5209_s1 + $0xf0] sm:$0xff]  ;;  %v388_v6 = vld [vmem:[%s5209_s1 + $0xe8] sm:$0xff]  ;;  %s4114_s27 = scalar_select %p325_p10, %s3966_s13, 1  ;;  %vm579_vm0 = vcmask 523264   ;;  %vm1146_vm1 = vcmask 130048  }
  0x14   : > { %v374_v1 = vld [vmem:[%s5209_s1 + $0x78] sm:$0xff]  ;;  %3205 = vmatprep.subr.mxu0 %v390_v0  ;;  %v373_v4 = vld [vmem:[%s5209_s1 + $0x70] sm:$0xff]  ;;  %v372_v8 = vld [vmem:[%s5209_s1 + $0x68] sm:$0xff]  ;;  %vm3054_vm2 = vcmask 80896   ;;  %vm3068_vm3 = vcmask 73728   ;;  %s3837_s13 = scalar_lea.vmem %s3836_s24, 32 }
  0x15   : > { %v422_v3 = vld [vmem:[%s5209_s1 + $0x1f8] sm:$0xff]  ;;  %3206 = vmatpush3.msra.mxu0 %v374_v1  ;;  %v421_v7 = vld [vmem:[%s5209_s1 + $0x1f0] sm:$0xff]  ;;  %v420_v10 = vld [vmem:[%s5209_s1 + $0x1e8] sm:$0xff]  ;;  %s3790_s21 = smul.u32 224, %s4114_s27 }
  0x16   : > { %v406_v5 = vld [vmem:[%s5209_s1 + $0x178] sm:$0xff]  ;;  %3243 = vmatprep.subr.mxu1 %v422_v3  ;;  %3207 = vmatprep.subr.mxu0 %v389_v2  ;;  %v405_v9 = vld [vmem:[%s5209_s1 + $0x170] sm:$0xff]  ;;  %v387_v11 = vld [vmem:[%s5209_s1 + $0xe0] sm:$0xff] }
  0x17   : > { %3244 = vmatpush3.msra.mxu1 %v406_v5  ;;  %3208 = vmatpush3.msra.mxu0 %v373_v4  ;;  %v404_v12 = vld [vmem:[%s5209_s1 + $0x168] sm:$0xff]  ;;  %v371_v13 = vld [vmem:[%s5209_s1 + $0x60] sm:$0xff]  ;;  %v386_v15 = vld [vmem:[%s5209_s1 + $0xd8] sm:$0xff]  ;;  %s4168_s14 = scalar_lea.vmem %s5208_s0, %s3790_s21 }
  0x18   : > { %3245 = vmatprep.subr.mxu1 %v421_v7  ;;  %3209 = vmatprep.subr.mxu0 %v388_v6  ;;  %v419_v14 = vld [vmem:[%s5209_s1 + $0x1e0] sm:$0xff]  ;;  %v370_v17 = vld [vmem:[%s5209_s1 + $0x58] sm:$0xff]  ;;  %v385_v19 = vld [vmem:[%s5209_s1 + $0xd0] sm:$0xff] }
  0x19   : > { %3246 = vmatpush3.msra.mxu1 %v405_v9  ;;  %3210 = vmatpush3.msra.mxu0 %v372_v8  ;;  %v403_v16 = vld [vmem:[%s5209_s1 + $0x160] sm:$0xff]  ;;  %v418_v18 = vld [vmem:[%s5209_s1 + $0x1d8] sm:$0xff]  ;;  %v369_v21 = vld [vmem:[%s5209_s1 + $0x50] sm:$0xff] }
  0x1a   : > { %3247 = vmatprep.subr.mxu1 %v420_v10  ;;  %3211 = vmatprep.subr.mxu0 %v387_v11  ;;  %v402_v20 = vld [vmem:[%s5209_s1 + $0x158] sm:$0xff]  ;;  %v417_v22 = vld [vmem:[%s5209_s1 + $0x1d0] sm:$0xff]  ;;  %v384_v23 = vld [vmem:[%s5209_s1 + $0xc8] sm:$0xff] }
  0x1b   : > { %3248 = vmatpush3.msra.mxu1 %v404_v12  ;;  %3212 = vmatpush3.msra.mxu0 %v371_v13  ;;  %v401_v24 = vld [vmem:[%s5209_s1 + $0x150] sm:$0xff]  ;;  %v368_v25 = vld [vmem:[%s5209_s1 + $0x48] sm:$0xff]  ;;  %v383_v27 = vld [vmem:[%s5209_s1 + $0xc0] sm:$0xff] }
  0x1c   : > { %3249 = vmatprep.subr.mxu1 %v419_v14  ;;  %3213 = vmatprep.subr.mxu0 %v386_v15  ;;  %v416_v26 = vld [vmem:[%s5209_s1 + $0x1c8] sm:$0xff]  ;;  %v367_v29 = vld [vmem:[%s5209_s1 + $0x40] sm:$0xff]  ;;  %v382_v31 = vld [vmem:[%s5209_s1 + $0xb8] sm:$0xff] }
  0x1d   : > { %3250 = vmatpush3.msra.mxu1 %v403_v16  ;;  %3214 = vmatpush3.msra.mxu0 %v370_v17  ;;  %v400_v28 = vld [vmem:[%s5209_s1 + $0x148] sm:$0xff]  ;;  %v415_v30 = vld [vmem:[%s5209_s1 + $0x1c0] sm:$0xff]  ;;  %v366_v33 = vld [vmem:[%s5209_s1 + $0x38] sm:$0xff] }
  0x1e   : > { %3251 = vmatprep.subr.mxu1 %v418_v18  ;;  %3215 = vmatprep.subr.mxu0 %v385_v19  ;;  %v399_v32 = vld [vmem:[%s5209_s1 + $0x140] sm:$0xff]  ;;  %v414_v34 = vld [vmem:[%s5209_s1 + $0x1b8] sm:$0xff]  ;;  %v381_v35 = vld [vmem:[%s5209_s1 + $0xb0] sm:$0xff] }
  0x1f   : > { %3252 = vmatpush3.msra.mxu1 %v402_v20  ;;  %3216 = vmatpush3.msra.mxu0 %v369_v21  ;;  %v398_v36 = vld [vmem:[%s5209_s1 + $0x138] sm:$0xff]  ;;  %v365_v37 = vld [vmem:[%s5209_s1 + $0x30] sm:$0xff]  ;;  %v380_v39 = vld [vmem:[%s5209_s1 + $0xa8] sm:$0xff] }
  0x20   : > { %3253 = vmatprep.subr.mxu1 %v417_v22  ;;  %3217 = vmatprep.subr.mxu0 %v384_v23  ;;  %v413_v38 = vld [vmem:[%s5209_s1 + $0x1b0] sm:$0xff]  ;;  %v364_v41 = vld [vmem:[%s5209_s1 + $0x28] sm:$0xff]  ;;  %v379_v43 = vld [vmem:[%s5209_s1 + $0xa0] sm:$0xff] }
  0x21   : > { %3254 = vmatpush3.msra.mxu1 %v401_v24  ;;  %3218 = vmatpush3.msra.mxu0 %v368_v25  ;;  %v397_v40 = vld [vmem:[%s5209_s1 + $0x130] sm:$0xff]  ;;  %v412_v42 = vld [vmem:[%s5209_s1 + $0x1a8] sm:$0xff]  ;;  %v363_v45 = vld [vmem:[%s5209_s1 + $0x20] sm:$0xff] }
  0x22   : > { %3255 = vmatprep.subr.mxu1 %v416_v26  ;;  %3219 = vmatprep.subr.mxu0 %v383_v27  ;;  %v396_v44 = vld [vmem:[%s5209_s1 + $0x128] sm:$0xff]  ;;  %v411_v46 = vld [vmem:[%s5209_s1 + $0x1a0] sm:$0xff]  ;;  %v378_v47 = vld [vmem:[%s5209_s1 + $0x98] sm:$0xff] }
  0x23   : > { %3256 = vmatpush3.msra.mxu1 %v400_v28  ;;  %3220 = vmatpush3.msra.mxu0 %v367_v29  ;;  %v395_v48 = vld [vmem:[%s5209_s1 + $0x120] sm:$0xff]  ;;  %v362_v49 = vld [vmem:[%s5209_s1 + $0x18] sm:$0xff]  ;;  %v377_v51 = vld [vmem:[%s5209_s1 + $0x90] sm:$0xff] }
  0x24   : > { %3257 = vmatprep.subr.mxu1 %v415_v30  ;;  %3221 = vmatprep.subr.mxu0 %v382_v31  ;;  %v410_v50 = vld [vmem:[%s5209_s1 + $0x198] sm:$0xff]  ;;  %v361_v53 = vld [vmem:[%s5209_s1 + $0x10] sm:$0xff]  ;;  %v376_v55 = vld [vmem:[%s5209_s1 + $0x88] sm:$0xff] }
  0x25   : > { %3258 = vmatpush3.msra.mxu1 %v399_v32  ;;  %3222 = vmatpush3.msra.mxu0 %v366_v33  ;;  %v394_v52 = vld [vmem:[%s5209_s1 + $0x118] sm:$0xff]  ;;  %v409_v54 = vld [vmem:[%s5209_s1 + $0x190] sm:$0xff]  ;;  %v360_v57 = vld [vmem:[%s5209_s1 + $0x8] sm:$0xff] }
  0x26   : > { %3259 = vmatprep.subr.mxu1 %v414_v34  ;;  %3223 = vmatprep.subr.mxu0 %v381_v35  ;;  %v393_v56 = vld [vmem:[%s5209_s1 + $0x110] sm:$0xff]  ;;  %v408_v58 = vld [vmem:[%s5209_s1 + $0x188] sm:$0xff]  ;;  %v375_v59 = vld [vmem:[%s5209_s1 + $0x80] sm:$0xff] }
  0x27   : > { %3260 = vmatpush3.msra.mxu1 %v398_v36  ;;  %3224 = vmatpush3.msra.mxu0 %v365_v37  ;;  %v331_v60 = vld [vmem:[%s4168_s14 + $0x8] sm:$0xff]  ;;  %v359_v61 = vld [vmem:[%s5209_s1] sm:$0xff]  ;;  %v454_v1 = vld [vmem:[%s5209_s1 + $0x2f8] sm:$0xff] }
  0x28   : > { %3261 = vmatprep.subr.mxu1 %v413_v38  ;;  %3225 = vmatprep.subr.mxu0 %v380_v39  ;;  %v392_v62 = vld [vmem:[%s5209_s1 + $0x108] sm:$0xff]  ;;  %v330_v63 = vld [vmem:[%s4168_s14] sm:$0xff]  ;;  %v333_v3 = vld [vmem:[%s4168_s14 + $0x18] sm:$0xff] }
  0x29   : > { %3262 = vmatpush3.msra.mxu1 %v397_v40  ;;  %3226 = vmatpush3.msra.mxu0 %v364_v41  ;;  %v407_v0 = vld [vmem:[%s5209_s1 + $0x180] sm:$0xff]  ;;  %v438_v4 = vld [vmem:[%s5209_s1 + $0x278] sm:$0xff]  ;;  %v332_v5 = vld [vmem:[%s4168_s14 + $0x10] sm:$0xff] }
  0x2a   : > { %3263 = vmatprep.subr.mxu1 %v412_v42  ;;  %3227 = vmatprep.subr.mxu0 %v379_v43  ;;  %v391_v2 = vld [vmem:[%s5209_s1 + $0x100] sm:$0xff]  ;;  %v453_v6 = vld [vmem:[%s5209_s1 + $0x2f0] sm:$0xff]  ;;  %v486_v7 = vld [vmem:[%s5209_s1 + $0x3f8] sm:$0xff] }
  0x2b   : > { %3264 = vmatpush3.msra.mxu1 %v396_v44  ;;  %3228 = vmatpush3.msra.mxu0 %v363_v45  ;;  %v437_v8 = vld [vmem:[%s5209_s1 + $0x270] sm:$0xff]  ;;  %v470_v9 = vld [vmem:[%s5209_s1 + $0x378] sm:$0xff]  ;;  %v452_v10 = vld [vmem:[%s5209_s1 + $0x2e8] sm:$0xff] }
  0x2c   : > { %3265 = vmatprep.subr.mxu1 %v411_v46  ;;  %3229 = vmatprep.subr.mxu0 %v378_v47  ;;  %v485_v11 = vld [vmem:[%s5209_s1 + $0x3f0] sm:$0xff]  ;;  %v436_v12 = vld [vmem:[%s5209_s1 + $0x268] sm:$0xff]  ;;  %v451_v14 = vld [vmem:[%s5209_s1 + $0x2e0] sm:$0xff] }
  0x2d   : > { %3266 = vmatpush3.msra.mxu1 %v395_v48  ;;  %3230 = vmatpush3.msra.mxu0 %v362_v49  ;;  %v469_v13 = vld [vmem:[%s5209_s1 + $0x370] sm:$0xff]  ;;  %v484_v15 = vld [vmem:[%s5209_s1 + $0x3e8] sm:$0xff]  ;;  %v435_v16 = vld [vmem:[%s5209_s1 + $0x260] sm:$0xff] }
  0x2e   : > { %3267 = vmatprep.subr.mxu1 %v410_v50  ;;  %3231 = vmatprep.subr.mxu0 %v377_v51  ;;  %v468_v17 = vld [vmem:[%s5209_s1 + $0x368] sm:$0xff]  ;;  %v450_v18 = vld [vmem:[%s5209_s1 + $0x2d8] sm:$0xff]  ;;  %v483_v19 = vld [vmem:[%s5209_s1 + $0x3e0] sm:$0xff] }
  0x2f   : > { %3268 = vmatpush3.msra.mxu1 %v394_v52  ;;  %3232 = vmatpush3.msra.mxu0 %v361_v53  ;;  %v434_v20 = vld [vmem:[%s5209_s1 + $0x258] sm:$0xff]  ;;  %v467_v21 = vld [vmem:[%s5209_s1 + $0x360] sm:$0xff]  ;;  %v449_v22 = vld [vmem:[%s5209_s1 + $0x2d0] sm:$0xff] }
  0x30   : > { %3269 = vmatprep.subr.mxu1 %v409_v54  ;;  %3233 = vmatprep.subr.mxu0 %v376_v55  ;;  %v482_v23 = vld [vmem:[%s5209_s1 + $0x3d8] sm:$0xff]  ;;  %v433_v24 = vld [vmem:[%s5209_s1 + $0x250] sm:$0xff]  ;;  %v448_v26 = vld [vmem:[%s5209_s1 + $0x2c8] sm:$0xff] }
  0x31   : > { %3270 = vmatpush3.msra.mxu1 %v393_v56  ;;  %3234 = vmatpush3.msra.mxu0 %v360_v57  ;;  %v466_v25 = vld [vmem:[%s5209_s1 + $0x358] sm:$0xff]  ;;  %v481_v27 = vld [vmem:[%s5209_s1 + $0x3d0] sm:$0xff]  ;;  %v432_v28 = vld [vmem:[%s5209_s1 + $0x248] sm:$0xff] }
  0x32   : > { %3271 = vmatprep.subr.mxu1 %v408_v58  ;;  %3235 = vmatprep.subr.mxu0 %v375_v59  ;;  %v465_v29 = vld [vmem:[%s5209_s1 + $0x350] sm:$0xff]  ;;  %v447_v30 = vld [vmem:[%s5209_s1 + $0x2c0] sm:$0xff]  ;;  %v480_v31 = vld [vmem:[%s5209_s1 + $0x3c8] sm:$0xff] }
  0x33   : > { %650 = vmatprep.mubr.f32.mxu0 %v331_v60  ;;  %3236 = vmatpush3.msra.mxu0 %v359_v61  ;;  %v431_v32 = vld [vmem:[%s5209_s1 + $0x240] sm:$0xff]  ;;  %v464_v33 = vld [vmem:[%s5209_s1 + $0x348] sm:$0xff]  ;;  %v446_v34 = vld [vmem:[%s5209_s1 + $0x2b8] sm:$0xff] }
  0x34   : > { %3272 = vmatpush3.msra.mxu1 %v392_v62  ;;  %651 = vmatmul.mubr.f32.vlgmr.msra.gmra.mxu0 %v330_v63  ;;  %v479_v35 = vld [vmem:[%s5209_s1 + $0x3c0] sm:$0xff]  ;;  %v430_v36 = vld [vmem:[%s5209_s1 + $0x238] sm:$0xff]  ;;  %v445_v38 = vld [vmem:[%s5209_s1 + $0x2b0] sm:$0xff] }
  0x35   : > { %3273 = vmatprep.subr.mxu1 %v407_v0  ;;  %3281 = vmatprep.subr.mxu0 %v454_v1  ;;  %v463_v37 = vld [vmem:[%s5209_s1 + $0x340] sm:$0xff]  ;;  %v478_v39 = vld [vmem:[%s5209_s1 + $0x3b8] sm:$0xff]  ;;  %v429_v40 = vld [vmem:[%s5209_s1 + $0x230] sm:$0xff] }
  0x36   : > { %3274 = vmatpush3.msra.mxu1 %v391_v2  ;;  %725 = vmatprep.mubr.f32.mxu1 %v333_v3  ;;  %v462_v41 = vld [vmem:[%s5209_s1 + $0x338] sm:$0xff]  ;;  %v444_v42 = vld [vmem:[%s5209_s1 + $0x2a8] sm:$0xff]  ;;  %v477_v43 = vld [vmem:[%s5209_s1 + $0x3b0] sm:$0xff] }
  0x37   : > { %3282 = vmatpush3.msra.mxu0 %v438_v4  ;;  %726 = vmatmul.mubr.f32.vlgmr.msra.gmra.mxu1 %v332_v5  ;;  %v428_v44 = vld [vmem:[%s5209_s1 + $0x228] sm:$0xff]  ;;  %v461_v45 = vld [vmem:[%s5209_s1 + $0x330] sm:$0xff]  ;;  %v443_v46 = vld [vmem:[%s5209_s1 + $0x2a0] sm:$0xff] }
  0x38   : > { %3283 = vmatprep.subr.mxu0 %v453_v6  ;;  %3319 = vmatprep.subr.mxu1 %v486_v7  ;;  %v476_v47 = vld [vmem:[%s5209_s1 + $0x3a8] sm:$0xff]  ;;  %v427_v48 = vld [vmem:[%s5209_s1 + $0x220] sm:$0xff]  ;;  %v442_v50 = vld [vmem:[%s5209_s1 + $0x298] sm:$0xff] }
  0x39   : > { %3284 = vmatpush3.msra.mxu0 %v437_v8  ;;  %3320 = vmatpush3.msra.mxu1 %v470_v9  ;;  %v460_v49 = vld [vmem:[%s5209_s1 + $0x328] sm:$0xff]  ;;  %v475_v51 = vld [vmem:[%s5209_s1 + $0x3a0] sm:$0xff]  ;;  %v426_v52 = vld [vmem:[%s5209_s1 + $0x218] sm:$0xff] }
  0x3a   : > { %3285 = vmatprep.subr.mxu0 %v452_v10  ;;  %3321 = vmatprep.subr.mxu1 %v485_v11  ;;  %v459_v53 = vld [vmem:[%s5209_s1 + $0x320] sm:$0xff]  ;;  %v345_v54 = vld [vmem:[%s4168_s14 + $0x78] sm:$0xff]  ;;  %v441_v55 = vld [vmem:[%s5209_s1 + $0x290] sm:$0xff] }
  0x3b   : > { %3286 = vmatpush3.msra.mxu0 %v436_v12  ;;  %3322 = vmatpush3.msra.mxu1 %v469_v13  ;;  %v474_v56 = vld [vmem:[%s5209_s1 + $0x398] sm:$0xff]  ;;  %v344_v57 = vld [vmem:[%s4168_s14 + $0x70] sm:$0xff]  ;;  %v347_v60 = vld [vmem:[%s4168_s14 + $0x88] sm:$0xff] }
  0x3c   : > { %3287 = vmatprep.subr.mxu0 %v451_v14  ;;  %3323 = vmatprep.subr.mxu1 %v484_v15  ;;  %v458_v58 = vld [vmem:[%s5209_s1 + $0x318] sm:$0xff]  ;;  %v425_v59 = vld [vmem:[%s5209_s1 + $0x210] sm:$0xff]  ;;  %v440_v61 = vld [vmem:[%s5209_s1 + $0x288] sm:$0xff] }
  0x3d   : > { %3288 = vmatpush3.msra.mxu0 %v435_v16  ;;  %3324 = vmatpush3.msra.mxu1 %v468_v17  ;;  %v473_v62 = vld [vmem:[%s5209_s1 + $0x390] sm:$0xff]  ;;  %v346_v63 = vld [vmem:[%s4168_s14 + $0x80] sm:$0xff]  ;;  %v424_v0 = vld [vmem:[%s5209_s1 + $0x208] sm:$0xff] }
  0x3e   : > { %3289 = vmatprep.subr.mxu0 %v450_v18  ;;  %3325 = vmatprep.subr.mxu1 %v483_v19  ;;  %v457_v1 = vld [vmem:[%s5209_s1 + $0x310] sm:$0xff]  ;;  %v439_v2 = vld [vmem:[%s5209_s1 + $0x280] sm:$0xff]  ;;  %v472_v3 = vld [vmem:[%s5209_s1 + $0x388] sm:$0xff] }
  0x3f   : > { %3290 = vmatpush3.msra.mxu0 %v434_v20  ;;  %3326 = vmatpush3.msra.mxu1 %v467_v21  ;;  %v423_v4 = vld [vmem:[%s5209_s1 + $0x200] sm:$0xff]  ;;  %v335_v5 = vld [vmem:[%s4168_s14 + $0x28] sm:$0xff]  ;;  %v518_v9 = vld [vmem:[%s5209_s1 + $0x4f8] sm:$0xff] }
  0x40   : > { %3291 = vmatprep.subr.mxu0 %v449_v22  ;;  %3327 = vmatprep.subr.mxu1 %v482_v23  ;;  %v456_v6 = vld [vmem:[%s5209_s1 + $0x308] sm:$0xff]  ;;  %v334_v7 = vld [vmem:[%s4168_s14 + $0x20] sm:$0xff]  ;;  %v337_v11 = vld [vmem:[%s4168_s14 + $0x38] sm:$0xff] }
  0x41   : > { %3292 = vmatpush3.msra.mxu0 %v433_v24  ;;  %3328 = vmatpush3.msra.mxu1 %v466_v25  ;;  %v471_v8 = vld [vmem:[%s5209_s1 + $0x380] sm:$0xff]  ;;  %v502_v12 = vld [vmem:[%s5209_s1 + $0x478] sm:$0xff]  ;;  %v336_v13 = vld [vmem:[%s4168_s14 + $0x30] sm:$0xff] }
  0x42   : > { %3293 = vmatprep.subr.mxu0 %v448_v26  ;;  %3329 = vmatprep.subr.mxu1 %v481_v27  ;;  %v455_v10 = vld [vmem:[%s5209_s1 + $0x300] sm:$0xff]  ;;  %v517_v14 = vld [vmem:[%s5209_s1 + $0x4f0] sm:$0xff]  ;;  %v550_v15 = vld [vmem:[%s5209_s1 + $0x5f8] sm:$0xff] }
  0x43   : > { %3294 = vmatpush3.msra.mxu0 %v432_v28  ;;  %3330 = vmatpush3.msra.mxu1 %v465_v29  ;;  %v349_v16 = vld [vmem:[%s4168_s14 + $0x98] sm:$0xff]  ;;  %v501_v17 = vld [vmem:[%s5209_s1 + $0x470] sm:$0xff]  ;;  %v516_v20 = vld [vmem:[%s5209_s1 + $0x4e8] sm:$0xff] }
  0x44   : > { %3295 = vmatprep.subr.mxu0 %v447_v30  ;;  %3331 = vmatprep.subr.mxu1 %v480_v31  ;;  %v534_v18 = vld [vmem:[%s5209_s1 + $0x578] sm:$0xff]  ;;  %v348_v19 = vld [vmem:[%s4168_s14 + $0x90] sm:$0xff]  ;;  %v351_v22 = vld [vmem:[%s4168_s14 + $0xa8] sm:$0xff] }
  0x45   : > { %3296 = vmatpush3.msra.mxu0 %v431_v32  ;;  %3332 = vmatpush3.msra.mxu1 %v464_v33  ;;  %v549_v21 = vld [vmem:[%s5209_s1 + $0x5f0] sm:$0xff]  ;;  %v500_v23 = vld [vmem:[%s5209_s1 + $0x468] sm:$0xff]  ;;  %v350_v25 = vld [vmem:[%s4168_s14 + $0xa0] sm:$0xff] }
  0x46   : > { %3297 = vmatprep.subr.mxu0 %v446_v34  ;;  %3333 = vmatprep.subr.mxu1 %v479_v35  ;;  %v533_v24 = vld [vmem:[%s5209_s1 + $0x570] sm:$0xff]  ;;  %v515_v26 = vld [vmem:[%s5209_s1 + $0x4e0] sm:$0xff]  ;;  %v548_v27 = vld [vmem:[%s5209_s1 + $0x5e8] sm:$0xff] }
  0x47   : > { %3298 = vmatpush3.msra.mxu0 %v430_v36  ;;  %3334 = vmatpush3.msra.mxu1 %v463_v37  ;;  %v499_v28 = vld [vmem:[%s5209_s1 + $0x460] sm:$0xff]  ;;  %v532_v29 = vld [vmem:[%s5209_s1 + $0x568] sm:$0xff]  ;;  %v514_v30 = vld [vmem:[%s5209_s1 + $0x4d8] sm:$0xff] }
  0x48   : > { %3299 = vmatprep.subr.mxu0 %v445_v38  ;;  %3335 = vmatprep.subr.mxu1 %v478_v39  ;;  %v547_v31 = vld [vmem:[%s5209_s1 + $0x5e0] sm:$0xff]  ;;  %v498_v32 = vld [vmem:[%s5209_s1 + $0x458] sm:$0xff]  ;;  %v513_v34 = vld [vmem:[%s5209_s1 + $0x4d0] sm:$0xff] }
  0x49   : > { %3300 = vmatpush3.msra.mxu0 %v429_v40  ;;  %3336 = vmatpush3.msra.mxu1 %v462_v41  ;;  %v531_v33 = vld [vmem:[%s5209_s1 + $0x560] sm:$0xff]  ;;  %v546_v35 = vld [vmem:[%s5209_s1 + $0x5d8] sm:$0xff]  ;;  %v497_v36 = vld [vmem:[%s5209_s1 + $0x450] sm:$0xff] }
  0x4a   : > { %3301 = vmatprep.subr.mxu0 %v444_v42  ;;  %3337 = vmatprep.subr.mxu1 %v477_v43  ;;  %v530_v37 = vld [vmem:[%s5209_s1 + $0x558] sm:$0xff]  ;;  %v512_v38 = vld [vmem:[%s5209_s1 + $0x4c8] sm:$0xff]  ;;  %v545_v39 = vld [vmem:[%s5209_s1 + $0x5d0] sm:$0xff] }
  0x4b   : > { %3302 = vmatpush3.msra.mxu0 %v428_v44  ;;  %3338 = vmatpush3.msra.mxu1 %v461_v45  ;;  %v496_v40 = vld [vmem:[%s5209_s1 + $0x448] sm:$0xff]  ;;  %v529_v41 = vld [vmem:[%s5209_s1 + $0x550] sm:$0xff]  ;;  %v511_v42 = vld [vmem:[%s5209_s1 + $0x4c0] sm:$0xff] }
  0x4c   : > { %3303 = vmatprep.subr.mxu0 %v443_v46  ;;  %3339 = vmatprep.subr.mxu1 %v476_v47  ;;  %v544_v43 = vld [vmem:[%s5209_s1 + $0x5c8] sm:$0xff]  ;;  %v495_v44 = vld [vmem:[%s5209_s1 + $0x440] sm:$0xff]  ;;  %v510_v46 = vld [vmem:[%s5209_s1 + $0x4b8] sm:$0xff] }
  0x4d   : > { %3304 = vmatpush3.msra.mxu0 %v427_v48  ;;  %3340 = vmatpush3.msra.mxu1 %v460_v49  ;;  %v528_v45 = vld [vmem:[%s5209_s1 + $0x548] sm:$0xff]  ;;  %v543_v47 = vld [vmem:[%s5209_s1 + $0x5c0] sm:$0xff]  ;;  %v494_v48 = vld [vmem:[%s5209_s1 + $0x438] sm:$0xff] }
  0x4e   : > { %3305 = vmatprep.subr.mxu0 %v442_v50  ;;  %3341 = vmatprep.subr.mxu1 %v475_v51  ;;  %v527_v49 = vld [vmem:[%s5209_s1 + $0x540] sm:$0xff]  ;;  %v509_v50 = vld [vmem:[%s5209_s1 + $0x4b0] sm:$0xff]  ;;  %v542_v51 = vld [vmem:[%s5209_s1 + $0x5b8] sm:$0xff] }
  0x4f   : > { %3306 = vmatpush3.msra.mxu0 %v426_v52  ;;  %3342 = vmatpush3.msra.mxu1 %v459_v53  ;;  %v493_v52 = vld [vmem:[%s5209_s1 + $0x430] sm:$0xff]  ;;  %v526_v53 = vld [vmem:[%s5209_s1 + $0x538] sm:$0xff] }
  0x50   : > { %655 = vmatprep.mubr.f32.mxu0 %v345_v54  ;;  %3307 = vmatprep.subr.mxu0 %v441_v55  ;;  %v508_v54 = vld [vmem:[%s5209_s1 + $0x4a8] sm:$0xff]  ;;  %v541_v55 = vld [vmem:[%s5209_s1 + $0x5b0] sm:$0xff] }
  0x51   : > { %3343 = vmatprep.subr.mxu1 %v474_v56  ;;  %656 = vmatmul.mubr.f32.gmra.mxu0 %v344_v57  ;;  %v492_v56 = vld [vmem:[%s5209_s1 + $0x428] sm:$0xff]  ;;  %v525_v57 = vld [vmem:[%s5209_s1 + $0x530] sm:$0xff] }
  0x52   : > { %3344 = vmatpush3.msra.mxu1 %v458_v58  ;;  %3308 = vmatpush3.msra.mxu0 %v425_v59  ;;  %v507_v58 = vld [vmem:[%s5209_s1 + $0x4a0] sm:$0xff]  ;;  %v540_v59 = vld [vmem:[%s5209_s1 + $0x5a8] sm:$0xff] }
  0x53   : > { %730 = vmatprep.mubr.f32.mxu1 %v347_v60  ;;  %3309 = vmatprep.subr.mxu0 %v440_v61  ;;  %v491_v60 = vld [vmem:[%s5209_s1 + $0x420] sm:$0xff]  ;;  %v524_v61 = vld [vmem:[%s5209_s1 + $0x528] sm:$0xff] }
  0x54   : > { %3345 = vmatprep.subr.mxu1 %v473_v62  ;;  %731 = vmatmul.mubr.f32.gmra.mxu1 %v346_v63  ;;  %v506_v62 = vld [vmem:[%s5209_s1 + $0x498] sm:$0xff]  ;;  %v539_v63 = vld [vmem:[%s5209_s1 + $0x5a0] sm:$0xff] }
  0x55   : > { %3310 = vmatpush3.msra.mxu0 %v424_v0  ;;  %3346 = vmatpush3.msra.mxu1 %v457_v1  ;;  %v490_v0 = vld [vmem:[%s5209_s1 + $0x418] sm:$0xff]  ;;  %v523_v1 = vld [vmem:[%s5209_s1 + $0x520] sm:$0xff] }
  0x56   : > { %3311 = vmatprep.subr.mxu0 %v439_v2  ;;  %3347 = vmatprep.subr.mxu1 %v472_v3  ;;  %v505_v2 = vld [vmem:[%s5209_s1 + $0x490] sm:$0xff]  ;;  %v538_v3 = vld [vmem:[%s5209_s1 + $0x598] sm:$0xff] }
  0x57   : > { %3312 = vmatpush3.msra.mxu0 %v423_v4  ;;  %800 = vmatprep.mubr.f32.mxu0 %v335_v5  ;;  %v489_v4 = vld [vmem:[%s5209_s1 + $0x410] sm:$0xff]  ;;  %v522_v5 = vld [vmem:[%s5209_s1 + $0x518] sm:$0xff] }
  0x58   : > { %3348 = vmatpush3.msra.mxu1 %v456_v6  ;;  %801 = vmatmul.mubr.f32.vlgmr.msra.gmra.mxu0 %v334_v7  ;;  %v504_v6 = vld [vmem:[%s5209_s1 + $0x488] sm:$0xff]  ;;  %v537_v7 = vld [vmem:[%s5209_s1 + $0x590] sm:$0xff] }
  0x59   : > { %3349 = vmatprep.subr.mxu1 %v471_v8  ;;  %3357 = vmatprep.subr.mxu0 %v518_v9  ;;  %v488_v8 = vld [vmem:[%s5209_s1 + $0x408] sm:$0xff]  ;;  %v521_v9 = vld [vmem:[%s5209_s1 + $0x510] sm:$0xff] }
  0x5a   : > { %3350 = vmatpush3.msra.mxu1 %v455_v10  ;;  %875 = vmatprep.mubr.f32.mxu1 %v337_v11  ;;  %v503_v10 = vld [vmem:[%s5209_s1 + $0x480] sm:$0xff]  ;;  %v536_v11 = vld [vmem:[%s5209_s1 + $0x588] sm:$0xff] }
  0x5b   : > { %3358 = vmatpush3.msra.mxu0 %v502_v12  ;;  %876 = vmatmul.mubr.f32.vlgmr.msra.gmra.mxu1 %v336_v13  ;;  %v487_v12 = vld [vmem:[%s5209_s1 + $0x400] sm:$0xff]  ;;  %v339_v13 = vld [vmem:[%s4168_s14 + $0x48] sm:$0xff] }
  0x5c   : > { %3359 = vmatprep.subr.mxu0 %v517_v14  ;;  %3395 = vmatprep.subr.mxu1 %v550_v15  ;;  %v520_v14 = vld [vmem:[%s5209_s1 + $0x508] sm:$0xff]  ;;  %v338_v15 = vld [vmem:[%s4168_s14 + $0x40] sm:$0xff] }
  0x5d   : > { %805 = vmatprep.mubr.f32.mxu0 %v349_v16  ;;  %3360 = vmatpush3.msra.mxu0 %v501_v17  ;;  %v535_v16 = vld [vmem:[%s5209_s1 + $0x580] sm:$0xff] }
  0x5e   : > { %3396 = vmatpush3.msra.mxu1 %v534_v18  ;;  %806 = vmatmul.mubr.f32.gmra.mxu0 %v348_v19  ;;  %v519_v17 = vld [vmem:[%s5209_s1 + $0x500] sm:$0xff]  ;;  %v341_v18 = vld [vmem:[%s4168_s14 + $0x58] sm:$0xff] }
  0x5f   : > { %3361 = vmatprep.subr.mxu0 %v516_v20  ;;  %3397 = vmatprep.subr.mxu1 %v549_v21  ;;  %v566_v19 = vld [vmem:[%s5209_s1 + $0x678] sm:$0xff]  ;;  %v340_v20 = vld [vmem:[%s4168_s14 + $0x50] sm:$0xff]  ;;  %v3893_v21 = vmov 0.0  }
  0x60   : > { %880 = vmatprep.mubr.f32.mxu1 %v351_v22  ;;  %3362 = vmatpush3.msra.mxu0 %v500_v23  ;;  %v353_v22 = vld [vmem:[%s4168_s14 + $0xb8] sm:$0xff]  ;;  %v565_v23 = vld [vmem:[%s5209_s1 + $0x670] sm:$0xff] }
  0x61   : > { %3398 = vmatpush3.msra.mxu1 %v533_v24  ;;  %3363 = vmatprep.subr.mxu0 %v515_v26  ;;  %v352_v24 = vld [vmem:[%s4168_s14 + $0xb0] sm:$0xff]  ;;  %v564_v26 = vld [vmem:[%s5209_s1 + $0x668] sm:$0xff] }
  0x62   : > { %881 = vmatmul.mubr.f32.gmra.mxu1 %v350_v25  ;;  %3399 = vmatprep.subr.mxu1 %v548_v27  ;;  %v355_v25 = vld [vmem:[%s4168_s14 + $0xc8] sm:$0xff]  ;;  %v354_v27 = vld [vmem:[%s4168_s14 + $0xc0] sm:$0xff] }
  0x63   : > { %3364 = vmatpush3.msra.mxu0 %v499_v28  ;;  %3400 = vmatpush3.msra.mxu1 %v532_v29  ;;  %v563_v28 = vld [vmem:[%s5209_s1 + $0x660] sm:$0xff]  ;;  %v343_v29 = vld [vmem:[%s4168_s14 + $0x68] sm:$0xff] }
  0x64   : > { %3365 = vmatprep.subr.mxu0 %v514_v30  ;;  %3401 = vmatprep.subr.mxu1 %v547_v31  ;;  %v562_v30 = vld [vmem:[%s5209_s1 + $0x658] sm:$0xff]  ;;  %v561_v31 = vld [vmem:[%s5209_s1 + $0x650] sm:$0xff] }
  0x65   : > { %3366 = vmatpush3.msra.mxu0 %v498_v32  ;;  %3402 = vmatpush3.msra.mxu1 %v531_v33  ;;  %v560_v32 = vld [vmem:[%s5209_s1 + $0x648] sm:$0xff]  ;;  %v559_v33 = vld [vmem:[%s5209_s1 + $0x640] sm:$0xff] }
  0x66   : > { %3367 = vmatprep.subr.mxu0 %v513_v34  ;;  %3403 = vmatprep.subr.mxu1 %v546_v35  ;;  %v558_v34 = vld [vmem:[%s5209_s1 + $0x638] sm:$0xff]  ;;  %v557_v35 = vld [vmem:[%s5209_s1 + $0x630] sm:$0xff] }
  0x67   : > { %3368 = vmatpush3.msra.mxu0 %v497_v36  ;;  %3404 = vmatpush3.msra.mxu1 %v530_v37  ;;  %v556_v36 = vld [vmem:[%s5209_s1 + $0x628] sm:$0xff]  ;;  %v555_v37 = vld [vmem:[%s5209_s1 + $0x620] sm:$0xff] }
  0x68   : > { %3369 = vmatprep.subr.mxu0 %v512_v38  ;;  %3405 = vmatprep.subr.mxu1 %v545_v39  ;;  %v554_v38 = vld [vmem:[%s5209_s1 + $0x618] sm:$0xff]  ;;  %v553_v39 = vld [vmem:[%s5209_s1 + $0x610] sm:$0xff] }
  0x69   : > { %3370 = vmatpush3.msra.mxu0 %v496_v40  ;;  %3406 = vmatpush3.msra.mxu1 %v529_v41  ;;  %v552_v40 = vld [vmem:[%s5209_s1 + $0x608] sm:$0xff]  ;;  %v551_v41 = vld [vmem:[%s5209_s1 + $0x600] sm:$0xff] }
  0x6a   : > { %3371 = vmatprep.subr.mxu0 %v511_v42  ;;  %3407 = vmatprep.subr.mxu1 %v544_v43  ;;  %v574_v42 = vld [vmem:[%s5209_s1 + $0x6b8] sm:$0xff]  ;;  %v573_v43 = vld [vmem:[%s5209_s1 + $0x6b0] sm:$0xff] }
  0x6b   : > { %3372 = vmatpush3.msra.mxu0 %v495_v44  ;;  %3408 = vmatpush3.msra.mxu1 %v528_v45  ;;  %v572_v44 = vld [vmem:[%s5209_s1 + $0x6a8] sm:$0xff]  ;;  %v571_v45 = vld [vmem:[%s5209_s1 + $0x6a0] sm:$0xff] }
  0x6c   : > { %3373 = vmatprep.subr.mxu0 %v510_v46  ;;  %3409 = vmatprep.subr.mxu1 %v543_v47  ;;  %v570_v46 = vld [vmem:[%s5209_s1 + $0x698] sm:$0xff]  ;;  %v569_v47 = vld [vmem:[%s5209_s1 + $0x690] sm:$0xff] }
  0x6d   : > { %3374 = vmatpush3.msra.mxu0 %v494_v48  ;;  %3410 = vmatpush3.msra.mxu1 %v527_v49  ;;  %v568_v48 = vld [vmem:[%s5209_s1 + $0x688] sm:$0xff]  ;;  %v567_v49 = vld [vmem:[%s5209_s1 + $0x680] sm:$0xff] }
  0x6e   : > { %3375 = vmatprep.subr.mxu0 %v509_v50  ;;  %3411 = vmatprep.subr.mxu1 %v542_v51  ;;  %v342_v50 = vld [vmem:[%s4168_s14 + $0x60] sm:$0xff]  ;;  %v357_v51 = vld [vmem:[%s4168_s14 + $0xd8] sm:$0xff] }
  0x6f   : > { %3376 = vmatpush3.msra.mxu0 %v493_v52  ;;  %3412 = vmatpush3.msra.mxu1 %v526_v53  ;;  %v356_v52 = vld [vmem:[%s4168_s14 + $0xd0] sm:$0xff]  ;;  %v1125_v53 = vld [vmem:[%s5211_s3] sm:$0xff]  ;;  %s323_s14 = sand.u32 1, %s3883_s10  }
  0x70   : > { %3377 = vmatprep.subr.mxu0 %v508_v54  ;;  %3413 = vmatprep.subr.mxu1 %v541_v55  ;;  %s324_s26 = scalar_lea.vmem [#allocation2], %s323_s14  ;;  %s3071_s17 = scalar_lea.sflag [#allocation3], %s323_s14 }
  0x71   : > { %3378 = vmatpush3.msra.mxu0 %v492_v56  ;;  %3414 = vmatpush3.msra.mxu1 %v525_v57  ;;  %s3083_s28 = sshll.u32 %s324_s26, 4  ;;  %s3084_s28 = int_to_ptr.vmem [resolvable:$true] %s3083_s28 }
  0x72   : > { %3379 = vmatprep.subr.mxu0 %v507_v58  ;;  %3415 = vmatprep.subr.mxu1 %v540_v59  ;;  %s3831_s22 = scalar_lea.vmem %s3084_s28, 16  ;;  %p3838_p0 = scmp.lt.s32.totalorder %s3084_s28, %s3836_s24 }
  0x73   : > { %3380 = vmatpush3.msra.mxu0 %v491_v60  ;;  %3416 = vmatpush3.msra.mxu1 %v524_v61  ;;  %p3832_p11 = scmp.ne.s32.totalorder %s3084_s28, %s3831_s22  ;;  %p3839_p1 = scmp.lt.s32.totalorder %s3837_s13, %s3831_s22 }
  0x74   : > { %3381 = vmatprep.subr.mxu0 %v506_v62  ;;  %3417 = vmatprep.subr.mxu1 %v539_v63  ;;  %v575_v63 = vlaneseq }
  0x75   : > { %3382 = vmatpush3.msra.mxu0 %v490_v0  ;;  %3418 = vmatpush3.msra.mxu1 %v523_v1  ;;  %p3833_p12 = pnand %p3832_p11, %p3983_p5  ;;  %p3840_p2 = por %p3839_p1, %p3838_p0 }
  0x76   : > { %3383 = vmatprep.subr.mxu0 %v505_v2  ;;  %3419 = vmatprep.subr.mxu1 %v538_v3  ;;  %v4712_v2 = vshrl.u32 %v575_v63, 7  ;;  %v4774_v63 = vld [vmem:[%s5211_s3 + $0x28] sm:$0xff] }
  0x77   : > { %3384 = vmatpush3.msra.mxu0 %v489_v4  ;;  %3420 = vmatpush3.msra.mxu1 %v522_v5  ;;  %p3834_p13 = pneg %p3833_p12 }
  0x78   : > { %3385 = vmatprep.subr.mxu0 %v504_v6  ;;  %3421 = vmatprep.subr.mxu1 %v537_v7  ;;  %v4715_v5 = vsub.s32 0, %v4712_v2  ;;  %v358_v6 = vld [vmem:[%s5210_s2] sm:$0x7] }
  0x79   : > { %3386 = vmatpush3.msra.mxu0 %v488_v8  ;;  %3422 = vmatpush3.msra.mxu1 %v521_v9  ;;  %p3841_p3 = pnand %p3840_p2, %p3834_p13 }
  0x7a   : > { %3387 = vmatprep.subr.mxu0 %v503_v10  ;;  %3423 = vmatprep.subr.mxu1 %v536_v11  ;;  %v578_v9 = vrot.slane %v358_v6, %v4715_v5 }
  0x7b   : > { %3388 = vmatpush3.msra.mxu0 %v487_v12  ;;  %950 = vmatprep.mubr.f32.mxu0 %v339_v13 }
  0x7c   : > { %3424 = vmatpush3.msra.mxu1 %v520_v14  ;;  %951 = vmatmul.mubr.f32.vlgmr.msra.gmra.mxu0 %v338_v15 }
  0x7d   : > { %3425 = vmatprep.subr.mxu1 %v535_v16  ;;  %1036 = vmatprep.subr.mxu0 %v3893_v21 }
  0x7e   : > { %3426 = vmatpush3.msra.mxu1 %v519_v17  ;;  %1025 = vmatprep.mubr.f32.mxu1 %v341_v18 }
  0x7f   : > { %1037 = vmatpush1.msra.mxu0 %v566_v19  ;;  %1026 = vmatmul.mubr.f32.vlgmr.msra.gmra.mxu1 %v340_v20 }
  0x80   : > { %1038 = vmatprep.subr.mxu0 %v3893_v21  ;;  %955 = vmatprep.mubr.f32.mxu0 %v353_v22 }
  0x81   : > { %1039 = vmatpush1.msra.mxu0 %v565_v23  ;;  %1030 = vmatprep.mubr.f32.mxu1 %v355_v25 }
  0x82   : > { %956 = vmatmul.mubr.f32.gmra.mxu0 %v352_v24  ;;  %1040 = vmatprep.subr.mxu0 %v3893_v21 }
  0x83   : > { %1041 = vmatpush1.msra.mxu0 %v564_v26  ;;  %1031 = vmatmul.mubr.f32.gmra.mxu1 %v354_v27 }
  0x84   : > { %1042 = vmatprep.subr.mxu0 %v3893_v21  ;;  %3143 = vmatprep.mubr.msk.f32.mxu0 %vm579_vm0, %v343_v29 }
  0x85   : > { %1043 = vmatpush1.msra.mxu0 %v563_v28  ;;  %3563 = vmatprep.mubr.msk.f32.mxu1 %vm1146_vm1, %v1125_v53 }
  0x86   : > { %1044 = vmatprep.subr.mxu0 %v3893_v21 }
  0x87   : > { %1045 = vmatpush1.msra.mxu0 %v562_v30 }
  0x88   : > { %1046 = vmatprep.subr.mxu0 %v3893_v21 }
  0x89   : > { %1047 = vmatpush1.msra.mxu0 %v561_v31 }
  0x8a   : > { %1048 = vmatprep.subr.mxu0 %v3893_v21 }
  0x8b   : > { %1049 = vmatpush1.msra.mxu0 %v560_v32 }
  0x8c   : > { %1050 = vmatprep.subr.mxu0 %v3893_v21 }
  0x8d   : > { %1051 = vmatpush1.msra.mxu0 %v559_v33 }
  0x8e   : > { %1052 = vmatprep.subr.mxu0 %v3893_v21 }
  0x8f   : > { %1053 = vmatpush1.msra.mxu0 %v558_v34 }
  0x90   : > { %1054 = vmatprep.subr.mxu0 %v3893_v21 }
  0x91   : > { %1055 = vmatpush1.msra.mxu0 %v557_v35 }
  0x92   : > { %1056 = vmatprep.subr.mxu0 %v3893_v21 }
  0x93   : > { %1057 = vmatpush1.msra.mxu0 %v556_v36 }
  0x94   : > { %1058 = vmatprep.subr.mxu0 %v3893_v21 }
  0x95   : > { %1059 = vmatpush1.msra.mxu0 %v555_v37 }
  0x96   : > { %1060 = vmatprep.subr.mxu0 %v3893_v21 }
  0x97   : > { %1061 = vmatpush1.msra.mxu0 %v554_v38 }
  0x98   : > { %1062 = vmatprep.subr.mxu0 %v3893_v21 }
  0x99   : > { %1063 = vmatpush1.msra.mxu0 %v553_v39 }
  0x9a   : > { %1064 = vmatprep.subr.mxu0 %v3893_v21 }
  0x9b   : > { %1065 = vmatpush1.msra.mxu0 %v552_v40 }
  0x9c   : > { %1066 = vmatprep.subr.mxu0 %v3893_v21 }
  0x9d   : > { %1067 = vmatpush1.msra.mxu0 %v551_v41 }
  0x9e   : > { %1084 = vmatprep.subr.mxu0 %v3893_v21 }
  0x9f   : > { %1085 = vmatpush2.msra.mxu0 %v574_v42 }
  0xa0   : > { %1086 = vmatprep.subr.mxu0 %v3893_v21 }
  0xa1   : > { %1087 = vmatpush2.msra.mxu0 %v573_v43 }
  0xa2   : > { %1088 = vmatprep.subr.mxu0 %v3893_v21 }
  0xa3   : > { %1089 = vmatpush2.msra.mxu0 %v572_v44  ;;  %v4722_v44 = vsub.s32 1, %v4712_v2 }
  0xa4   : > { %1090 = vmatprep.subr.mxu0 %v3893_v21 }
  0xa5   : > { %1091 = vmatpush2.msra.mxu0 %v571_v45 }
  0xa6   : > { %1092 = vmatprep.subr.mxu0 %v3893_v21 }
  0xa7   : > { %1093 = vmatpush2.msra.mxu0 %v570_v46 }
  0xa8   : > { %1094 = vmatprep.subr.mxu0 %v3893_v21 }
  0xa9   : > { %1095 = vmatpush2.msra.mxu0 %v569_v47 }
  0xaa   : > { %1096 = vmatprep.subr.mxu0 %v3893_v21 }
  0xab   : > { %1097 = vmatpush2.msra.mxu0 %v568_v48 }
  0xac   : > { %1098 = vmatprep.subr.mxu0 %v3893_v21 }
  0xad   : > { %1099 = vmatpush2.msra.mxu0 %v567_v49  ;;  %v1116_v49 = vrot.slane %v358_v6, %v4722_v44 }
  0xae   : > { %1101 = vmatmul.mubr.f32.vlgmr.msra.gmra.mxu0 %v342_v50  ;;  %v4726_v50 = vsub.s32 2, %v4712_v2 }
  0xaf   : > { %3144 = vmatprep.mubr.msk.f32.mxu0 %vm579_vm0, %v357_v51 }
  0xb2   : > { %1106 = vmatmul.mubr.f32.gmra.mxu0 %v356_v52 }
  0xb3   : > { %3661 = vmatprep.mubr.msk.f32.mxu0 %vm1146_vm1, %v1125_v53 }
  0xf4   : > { %v3237_v54 = vpop.f32.mrf.mxu0 }
  0xf6   : > { %v3238_v55 = vpop.f32.mrf.mxu0 }
  0xf7   : > { %v3275_v56 = vpop.f32.mrf.mxu1  ;;  %v3239_v10 = vadd.f32 %v3238_v55, %v3237_v54  ;;  %v1122_v55 = vrot.slane %v358_v6, %v4726_v50  ;;  %v4816_v6 = vld [vmem:[%s5211_s3 + $0x50] sm:$0xff] }
  0xf9   : > { %v3276_v58 = vpop.f32.mrf.mxu1  ;;  %v653_v13 = vadd.f32 %v3239_v10, %v578_v9  ;;  %v4852_v10 = vld [vmem:[%s5211_s3 + $0x70] sm:$0xff] }
  0xfa   : > { %v3277_v14 = vadd.f32 %v3276_v58, %v3275_v56 }
  0xfc   : > { %v728_v19 = vadd.f32 %v3277_v14, %v653_v13  ;;  %v4882_v13 = vld [vmem:[%s5211_s3 + $0x88] sm:$0xff]  ;;  %v1985_v14 = vld [vmem:[%s5213_s5 + $0x78] sm:$0xff] }
 0x111   : > { %v3240_v57 = vpop.f32.mrf.mxu0 }
 0x113   : > { %v3241_v59 = vpop.f32.mrf.mxu0 }
 0x114   : > { %v3278_v60 = vpop.f32.mrf.mxu1  ;;  %v3242_v15 = vadd.f32 %v3241_v59, %v3240_v57  ;;  %v4738_v59 = vld [vmem:[%s5211_s3 + $0x8] sm:$0xff] }
 0x116   : > { %v3279_v61 = vpop.f32.mrf.mxu1  ;;  %v658_v20 = vadd.f32 %v3242_v15, %v578_v9  ;;  %v4846_v9 = vld [vmem:[%s5211_s3 + $0x68] sm:$0xff]  ;;  %v1984_v15 = vld [vmem:[%s5213_s5 + $0x70] sm:$0xff] }
 0x117   : > { %v3280_v21 = vadd.f32 %v3279_v61, %v3278_v60  ;;  %v4744_v60 = vld [vmem:[%s5211_s3 + $0x10] sm:$0xff]  ;;  %v4756_v61 = vld [vmem:[%s5211_s3 + $0x18] sm:$0xff] }
 0x118   : > { %v3313_v62 = vpop.f32.mrf.mxu0 }
 0x119   : > { %v733_v27 = vadd.f32 %v3280_v21, %v658_v20  ;;  %v1979_v20 = vld [vmem:[%s5213_s5 + $0x48] sm:$0xff]  ;;  %v1978_v21 = vld [vmem:[%s5213_s5 + $0x40] sm:$0xff] }
 0x11a   : > { %v3314_v0 = vpop.f32.mrf.mxu0 }
 0x11b   : > { %v3351_v1 = vpop.f32.mrf.mxu1  ;;  %v3315_v18 = vadd.f32 %v3314_v0, %v3313_v62  ;;  %v4762_v62 = vld [vmem:[%s5211_s3 + $0x20] sm:$0xff]  ;;  %v4780_v0 = vld [vmem:[%s5211_s3 + $0x30] sm:$0xff] }
 0x11d   : > { %v3352_v4 = vpop.f32.mrf.mxu1  ;;  %v803_v24 = vadd.f32 %v3315_v18, %v728_v19  ;;  %v1981_v18 = vld [vmem:[%s5213_s5 + $0x58] sm:$0xff]  ;;  %v1980_v19 = vld [vmem:[%s5213_s5 + $0x50] sm:$0xff] }
 0x11e   : > { %v3316_v3 = vpop.f32.mrf.mxu0  ;;  %v3353_v25 = vadd.f32 %v3352_v4, %v3351_v1  ;;  %v4792_v1 = vld [vmem:[%s5211_s3 + $0x38] sm:$0xff]  ;;  %v4810_v4 = vld [vmem:[%s5211_s3 + $0x48] sm:$0xff] }
 0x120   : > { %v3317_v7 = vpop.f32.mrf.mxu0  ;;  %v878_v31 = vadd.f32 %v3353_v25, %v803_v24  ;;  %v1975_v24 = vld [vmem:[%s5213_s5 + $0x28] sm:$0xff]  ;;  %v1974_v25 = vld [vmem:[%s5213_s5 + $0x20] sm:$0xff] }
 0x121   : > { %v3318_v26 = vadd.f32 %v3317_v7, %v3316_v3  ;;  %v4798_v3 = vld [vmem:[%s5211_s3 + $0x40] sm:$0xff]  ;;  %v4828_v7 = vld [vmem:[%s5211_s3 + $0x58] sm:$0xff] }
 0x122   : > { %v3354_v8 = vpop.f32.mrf.mxu1 }
 0x123   : > { %v808_v32 = vadd.f32 %v3318_v26, %v733_v27  ;;  %v1973_v26 = vld [vmem:[%s5213_s5 + $0x18] sm:$0xff]  ;;  %v1972_v27 = vld [vmem:[%s5213_s5 + $0x10] sm:$0xff] }
 0x124   : > { %v3355_v12 = vpop.f32.mrf.mxu1 }
 0x125   : > { %v3356_v33 = vadd.f32 %v3355_v12, %v3354_v8  ;;  %v4834_v8 = vld [vmem:[%s5211_s3 + $0x60] sm:$0xff] }
 0x126   : > { %v4870_v12 = vld [vmem:[%s5211_s3 + $0x80] sm:$0xff] }
 0x127   : > { %v883_v38 = vadd.f32 %v3356_v33, %v808_v32 }
 0x13c   : > { %v3389_v11 = vpop.f32.mrf.mxu0 }
 0x13e   : > { %v3390_v16 = vpop.f32.mrf.mxu0 }
 0x13f   : > { %v3427_v17 = vpop.f32.mrf.mxu1  ;;  %v3391_v28 = vadd.f32 %v3390_v16, %v3389_v11  ;;  %v4864_v11 = vld [vmem:[%s5211_s3 + $0x78] sm:$0xff]  ;;  %v1983_v16 = vld [vmem:[%s5213_s5 + $0x68] sm:$0xff] }
 0x141   : > { %v3428_v23 = vpop.f32.mrf.mxu1  ;;  %v953_v34 = vadd.f32 %v3391_v28, %v878_v31  ;;  %v1971_v28 = vld [vmem:[%s5213_s5 + $0x8] sm:$0xff] }
 0x142   : > { %v3392_v22 = vpop.f32.mrf.mxu0  ;;  %v3429_v35 = vadd.f32 %v3428_v23, %v3427_v17  ;;  %v1982_v17 = vld [vmem:[%s5213_s5 + $0x60] sm:$0xff]  ;;  %v1976_v23 = vld [vmem:[%s5213_s5 + $0x30] sm:$0xff] }
 0x143   : > { %v3430_v30 = vpop.f32.mrf.mxu1 }
 0x144   : > { %v3393_v29 = vpop.f32.mrf.mxu0  ;;  %v1028_v41 = vadd.f32 %v3429_v35, %v953_v34 }
 0x145   : > { %v3394_v36 = vadd.f32 %v3393_v29, %v3392_v22  ;;  %v3431_v37 = vpop.f32.mrf.mxu1  ;;  %v1977_v22 = vld [vmem:[%s5213_s5 + $0x38] sm:$0xff]  ;;  %v1970_v29 = vld [vmem:[%s5213_s5] sm:$0xff] }
 0x146   : > { %v3432_v40 = vadd.f32 %v3431_v37, %v3430_v30 }
 0x147   : > { %v958_v39 = vadd.f32 %v3394_v36, %v883_v38  ;;  %v1143_v36 = vld [vmem:[%s5212_s4] sm:$0xff] }
 0x148   : > { %v1320_v38 = vrot.slane %v1143_v36, %v4722_v44 }
 0x149   : > { %v1033_v46 = vadd.f32 %v3432_v40, %v958_v39  ;;  %v4941_v39 = vsub.s32 3, %v4712_v2 }
 0x16e   : > { %v1102_v42 = vpop.f32.mrf.mxu0 }
 0x16f   : > { %v1103_v43 = vadd.f32 %v1102_v42, %v1028_v41  ;;  %v1231_v41 = vrot.slane %v1143_v36, %v4715_v5  ;;  %v1409_v42 = vrot.slane %v1143_v36, %v4726_v50 }
 0x170   : > { %v1104_v45 = vpop.f32.mrf.mxu0 }
 0x171   : > { %v1111_v48 = vmax.f32 %v1103_v43, 0.0  ;;  %v4946_v43 = vsub.s32 4, %v4712_v2 }
 0x172   : > { %v1107_v47 = vpop.f32.mrf.mxu0 }
 0x173   : > { %v1108_v51 = vadd.f32 %v1107_v47, %v1033_v46  ;;  %v1117_v54 = vmul.f32 %v1116_v49, %v1111_v48  ;;  %v4949_v46 = vsub.s32 5, %v4712_v2  ;;  %v1498_v48 = vrot.slane %v1143_v36, %v4941_v39 }
 0x174   : > { %v1109_v52 = vpop.f32.mrf.mxu0 }
 0x175   : > { %v1112_v53 = vmax.f32 %v1108_v51, 0.0  ;;  %v4731_v58 = vadd.f32 %v1122_v55, %v1117_v54  ;;  %v1764_v51 = vsub.s32 6, %v4712_v2 }
 0x177   : > { %v1118_v56 = vmul.f32 %v1116_v49, %v1112_v53 }
 0x179   : > { %v4729_v57 = vadd.f32 %v1122_v55, %v1118_v56  ;;  %v1587_v55 = vrot.slane %v1143_v36, %v4946_v43 }
 0x17b   : > { %3559 = vmatprep.subr.mxu1 %v4729_v57 }
 0x17c   : > { %3560 = vmatpush3.msra.mxu1 %v4729_v57 }
 0x17d   : > { %3561 = vmatprep.subr.mxu1 %v4731_v58 }
 0x17e   : > { %3562 = vmatpush3.msra.mxu1 %v4731_v58 }
 0x17f   : > { %3564 = vmatmul.mubr.msk.f32.vlgmr.msra.gmra.mxu1 %vm1146_vm1, %v4738_v59  ;;  %3566 = vmatprep.subr.mxu1 %v4729_v57 }
 0x180   : > { %3567 = vmatpush3.msra.mxu1 %v4729_v57  ;;  %3570 = vmatprep.mubr.msk.f32.mxu1 %vm1146_vm1, %v4744_v60 }
 0x181   : > { %3568 = vmatprep.subr.mxu1 %v4731_v58 }
 0x182   : > { %3569 = vmatpush3.msra.mxu1 %v4731_v58 }
 0x183   : > { %3571 = vmatmul.mubr.msk.f32.vlgmr.msra.gmra.mxu1 %vm1146_vm1, %v4756_v61  ;;  %3573 = vmatprep.subr.mxu1 %v4729_v57 }
 0x184   : > { %3574 = vmatpush3.msra.mxu1 %v4729_v57  ;;  %3577 = vmatprep.mubr.msk.f32.mxu1 %vm1146_vm1, %v4762_v62 }
 0x185   : > { %3575 = vmatprep.subr.mxu1 %v4731_v58 }
 0x186   : > { %3576 = vmatpush3.msra.mxu1 %v4731_v58 }
 0x187   : > { %3578 = vmatmul.mubr.msk.f32.vlgmr.msra.gmra.mxu1 %vm1146_vm1, %v4774_v63  ;;  %3580 = vmatprep.subr.mxu1 %v4729_v57 }
 0x188   : > { %3581 = vmatpush3.msra.mxu1 %v4729_v57  ;;  %3584 = vmatprep.mubr.msk.f32.mxu1 %vm1146_vm1, %v4780_v0 }
 0x189   : > { %3582 = vmatprep.subr.mxu1 %v4731_v58 }
 0x18a   : > { %3583 = vmatpush3.msra.mxu1 %v4731_v58 }
 0x18b   : > { %3585 = vmatmul.mubr.msk.f32.vlgmr.msra.gmra.mxu1 %vm1146_vm1, %v4792_v1  ;;  %3587 = vmatprep.subr.mxu1 %v4729_v57 }
 0x18c   : > { %3588 = vmatpush3.msra.mxu1 %v4729_v57  ;;  %3591 = vmatprep.mubr.msk.f32.mxu1 %vm1146_vm1, %v4798_v3 }
 0x18d   : > { %3589 = vmatprep.subr.mxu1 %v4731_v58 }
 0x18e   : > { %3590 = vmatpush3.msra.mxu1 %v4731_v58 }
 0x18f   : > { %3592 = vmatmul.mubr.msk.f32.vlgmr.msra.gmra.mxu1 %vm1146_vm1, %v4810_v4  ;;  %3594 = vmatprep.subr.mxu1 %v4729_v57 }
 0x190   : > { %3595 = vmatpush3.msra.mxu1 %v4729_v57  ;;  %3598 = vmatprep.mubr.msk.f32.mxu1 %vm1146_vm1, %v4816_v6 }
 0x191   : > { %3596 = vmatprep.subr.mxu1 %v4731_v58 }
 0x192   : > { %3597 = vmatpush3.msra.mxu1 %v4731_v58 }
 0x193   : > { %3599 = vmatmul.mubr.msk.f32.vlgmr.msra.gmra.mxu1 %vm1146_vm1, %v4828_v7  ;;  %3601 = vmatprep.subr.mxu1 %v4729_v57 }
 0x194   : > { %3602 = vmatpush3.msra.mxu1 %v4729_v57  ;;  %3605 = vmatprep.mubr.msk.f32.mxu1 %vm1146_vm1, %v4834_v8 }
 0x195   : > { %3603 = vmatprep.subr.mxu1 %v4731_v58 }
 0x196   : > { %3604 = vmatpush3.msra.mxu1 %v4731_v58 }
 0x197   : > { %3606 = vmatmul.mubr.msk.f32.vlgmr.msra.gmra.mxu1 %vm1146_vm1, %v4846_v9  ;;  %3608 = vmatprep.subr.mxu1 %v4729_v57 }
 0x198   : > { %3609 = vmatpush3.msra.mxu1 %v4729_v57  ;;  %3612 = vmatprep.mubr.msk.f32.mxu1 %vm1146_vm1, %v4852_v10 }
 0x199   : > { %3610 = vmatprep.subr.mxu1 %v4731_v58 }
 0x19a   : > { %3611 = vmatpush3.msra.mxu1 %v4731_v58 }
 0x19b   : > { %3613 = vmatmul.mubr.msk.f32.vlgmr.msra.gmra.mxu1 %vm1146_vm1, %v4864_v11  ;;  %3615 = vmatprep.subr.mxu1 %v4729_v57 }
 0x19c   : > { %3616 = vmatpush3.msra.mxu1 %v4729_v57  ;;  %3619 = vmatprep.mubr.msk.f32.mxu1 %vm1146_vm1, %v4870_v12 }
 0x19d   : > { %3617 = vmatprep.subr.mxu1 %v4731_v58 }
 0x19e   : > { %3618 = vmatpush3.msra.mxu1 %v4731_v58 }
 0x19f   : > { %3620 = vmatmul.mubr.msk.f32.vlgmr.msra.gmra.mxu1 %vm1146_vm1, %v4882_v13  ;;  %3622 = vmatprep.subr.mxu1 %v1985_v14 }
 0x1a0   : > { %3623 = vmatpush3.msra.mxu1 %v1985_v14  ;;  %v1676_v14 = vrot.slane %v1143_v36, %v4949_v46 }
 0x1a1   : > { %3624 = vmatprep.subr.mxu1 %v1984_v15 }
 0x1a2   : > { %3625 = vmatpush3.msra.mxu1 %v1984_v15  ;;  %v1853_v15 = vsub.s32 7, %v4712_v2  ;;  %v3166_v2 = vld [vmem:[%s5214_s6 + $0x8] sm:$0x3f] }
 0x1a3   : > { %3626 = vmatprep.subr.mxu1 %v1983_v16 }
 0x1a4   : > { %3627 = vmatpush3.msra.mxu1 %v1983_v16 }
 0x1a5   : > { %3628 = vmatprep.subr.mxu1 %v1982_v17 }
 0x1a6   : > { %3629 = vmatpush3.msra.mxu1 %v1982_v17 }
 0x1a7   : > { %3630 = vmatprep.subr.mxu1 %v1981_v18 }
 0x1a8   : > { %3631 = vmatpush3.msra.mxu1 %v1981_v18 }
 0x1a9   : > { %3632 = vmatprep.subr.mxu1 %v1980_v19 }
 0x1aa   : > { %3633 = vmatpush3.msra.mxu1 %v1980_v19 }
 0x1ab   : > { %3634 = vmatprep.subr.mxu1 %v1979_v20 }
 0x1ac   : > { %3635 = vmatpush3.msra.mxu1 %v1979_v20 }
 0x1ad   : > { %3636 = vmatprep.subr.mxu1 %v1978_v21 }
 0x1ae   : > { %3637 = vmatpush3.msra.mxu1 %v1978_v21  ;;  %v1765_v21 = vrot.slane %v1143_v36, %v1764_v51 }
 0x1af   : > { %3638 = vmatprep.subr.mxu1 %v1977_v22 }
 0x1b0   : > { %3639 = vmatpush3.msra.mxu1 %v1977_v22 }
 0x1b1   : > { %3640 = vmatprep.subr.mxu1 %v1976_v23 }
 0x1b2   : > { %3641 = vmatpush3.msra.mxu1 %v1976_v23 }
 0x1b3   : > { %3642 = vmatprep.subr.mxu1 %v1975_v24 }
 0x1b4   : > { %3643 = vmatpush3.msra.mxu1 %v1975_v24 }
 0x1b5   : > { %3644 = vmatprep.subr.mxu1 %v1974_v25 }
 0x1b6   : > { %3645 = vmatpush3.msra.mxu1 %v1974_v25 }
 0x1b7   : > { %3646 = vmatprep.subr.mxu1 %v1973_v26 }
 0x1b8   : > { %3647 = vmatpush3.msra.mxu1 %v1973_v26 }
 0x1b9   : > { %3648 = vmatprep.subr.mxu1 %v1972_v27 }
 0x1ba   : > { %3649 = vmatpush3.msra.mxu1 %v1972_v27  ;;  %v1854_v27 = vrot.slane %v1143_v36, %v1853_v15  ;;  %v1145_v36 = vld [vmem:[%s5214_s6] sm:$0x3f] }
 0x1bb   : > { %3650 = vmatprep.subr.mxu1 %v1971_v28 }
 0x1bc   : > { %3651 = vmatpush3.msra.mxu1 %v1971_v28 }
 0x1bd   : > { %3652 = vmatprep.subr.mxu1 %v1970_v29 }
 0x1be   : > { %3653 = vmatpush3.msra.mxu1 %v1970_v29 }
 0x23f   : > { %v3565_v30 = vpop.f32.mrf.mxu1 }
 0x240   : > { %v1233_v52 = vmul.f32 %v3565_v30, %v1231_v41 }
 0x241   : > { %v1219_v31 = vpop.f32.mrf.mxu1 }
 0x242   : > { %v1232_v16 = vmul.f32 %v1231_v41, %v1219_v31 }
 0x243   : > { %v3572_v32 = vpop.f32.mrf.mxu1 }
 0x244   : > { %v1322_v47 = vmul.f32 %v3572_v32, %v1320_v38 }
 0x245   : > { %v1308_v33 = vpop.f32.mrf.mxu1 }
 0x246   : > { %v1321_v53 = vmul.f32 %v1320_v38, %v1308_v33  ;;  %v1324_v17 = vadd.f32 %v1322_v47, %v1233_v52 }
 0x247   : > { %v3579_v34 = vpop.f32.mrf.mxu1 }
 0x248   : > { %v1411_v54 = vmul.f32 %v3579_v34, %v1409_v42  ;;  %v1323_v22 = vadd.f32 %v1321_v53, %v1232_v16  ;;  %v1951_v16 = vrot.slane %v1145_v36, %v4715_v5 }
 0x249   : > { %v1397_v35 = vpop.f32.mrf.mxu1 }
 0x24a   : > { %v1410_v18 = vmul.f32 %v1409_v42, %v1397_v35  ;;  %v1413_v23 = vadd.f32 %v1411_v54, %v1324_v17 }
 0x24b   : > { %v3586_v37 = vpop.f32.mrf.mxu1 }
 0x24c   : > { %v1500_v19 = vmul.f32 %v3586_v37, %v1498_v48  ;;  %v1412_v28 = vadd.f32 %v1410_v18, %v1323_v22  ;;  %v1959_v22 = vrot.slane %v1145_v36, %v4722_v44 }
 0x24d   : > { %v1486_v40 = vpop.f32.mrf.mxu1 }
 0x24e   : > { %v1499_v24 = vmul.f32 %v1498_v48, %v1486_v40  ;;  %v1502_v29 = vadd.f32 %v1500_v19, %v1413_v23 }
 0x24f   : > { %v3593_v45 = vpop.f32.mrf.mxu1 }
 0x250   : > { %v1589_v25 = vmul.f32 %v3593_v45, %v1587_v55  ;;  %v1501_v33 = vadd.f32 %v1499_v24, %v1412_v28  ;;  %v3163_v45 = vld [vmem:[%s5212_s4 + $0x8] ss:$0 sm:$0xff] }
 0x251   : > { %v1575_v49 = vpop.f32.mrf.mxu1 }
 0x252   : > { %v1588_v30 = vmul.f32 %v1587_v55, %v1575_v49  ;;  %v1591_v34 = vadd.f32 %v1589_v25, %v1502_v29 }
 0x253   : > { %v3600_v56 = vpop.f32.mrf.mxu1 }
 0x254   : > { %v1678_v32 = vmul.f32 %v3600_v56, %v1676_v14  ;;  %v1590_v41 = vadd.f32 %v1588_v30, %v1501_v33 }
 0x255   : > { %v1664_v20 = vpop.f32.mrf.mxu1 }
 0x256   : > { %v1677_v35 = vmul.f32 %v1676_v14, %v1664_v20  ;;  %v1680_v42 = vadd.f32 %v1678_v32, %v1591_v34  ;;  %v1989_v34 = vrot.slane %v1145_v36, %v4941_v39 }
 0x257   : > { %v3607_v26 = vpop.f32.mrf.mxu1 }
 0x258   : > { %v1767_v37 = vmul.f32 %v3607_v26, %v1765_v21  ;;  %v1679_v48 = vadd.f32 %v1677_v35, %v1590_v41  ;;  %v1965_v26 = vrot.slane %v1145_v36, %v4726_v50 }
 0x259   : > { %v1753_v31 = vpop.f32.mrf.mxu1 }
 0x25a   : > { %v1766_v47 = vmul.f32 %v1765_v21, %v1753_v31  ;;  %v1769_v49 = vadd.f32 %v1767_v37, %v1680_v42 }
 0x25b   : > { %v3614_v38 = vpop.f32.mrf.mxu1 }
 0x25c   : > { %v1856_v52 = vmul.f32 %v3614_v38, %v1854_v27  ;;  %v1768_v55 = vadd.f32 %v1766_v47, %v1679_v48  ;;  %v2070_v38 = vrot.slane %v1145_v36, %v4946_v43  ;;  %v2076_v47 = vrot.slane %v1145_v36, %v4949_v46  ;;  %v2977_v36 = vld [vmem:[%s5215_s7 + $0x70] sm:$0xff] }
 0x25d   : > { %v1842_v40 = vpop.f32.mrf.mxu1 }
 0x25e   : > { %v1855_v53 = vmul.f32 %v1854_v27, %v1842_v40  ;;  %v1858_v56 = vadd.f32 %v1856_v52, %v1769_v49  ;;  %v2976_v49 = vld [vmem:[%s5215_s7 + $0x68] sm:$0xff] }
 0x25f   : > { %v3621_v54 = vpop.f32.mrf.mxu1 }
 0x260   : > { %v1945_v14 = vmul.f32 %v3621_v54, %v3163_v45  ;;  %v1857_v18 = vadd.f32 %v1855_v53, %v1768_v55  ;;  %v2975_v53 = vld [vmem:[%s5215_s7 + $0x60] sm:$0xff]  ;;  %v2974_v54 = vld [vmem:[%s5215_s7 + $0x58] sm:$0xff]  ;;  %v2973_v55 = vld [vmem:[%s5215_s7 + $0x50] sm:$0xff] }
 0x261   : > { %v1931_v17 = vpop.f32.mrf.mxu1 }
 0x262   : > { %v1947_v19 = vadd.f32 %v1945_v14, %v1858_v56  ;;  %v1944_v20 = vmul.f32 %v3163_v45, %v1931_v17  ;;  %v2972_v56 = vld [vmem:[%s5215_s7 + $0x48] sm:$0xff]  ;;  %v2971_v14 = vld [vmem:[%s5215_s7 + $0x40] sm:$0xff]  ;;  %v2969_v17 = vld [vmem:[%s5215_s7 + $0x30] sm:$0xff] }
 0x264   : > { %v1953_v21 = vadd.f32 %v1951_v16, %v1947_v19  ;;  %v1946_v23 = vadd.f32 %v1944_v20, %v1857_v18 }
 0x266   : > { %v1955_v24 = vmax.f32 %v1953_v21, 0.0  ;;  %v1952_v25 = vadd.f32 %v1951_v16, %v1946_v23  ;;  %v2970_v16 = vld [vmem:[%s5215_s7 + $0x38] sm:$0xff] }
 0x268   : > { %v1961_v28 = vmul.f32 %v1959_v22, %v1955_v24  ;;  %v1954_v27 = vmax.f32 %v1952_v25, 0.0 }
 0x26a   : > { %v1960_v29 = vmul.f32 %v1959_v22, %v1954_v27  ;;  %v1967_v30 = vadd.f32 %v1965_v26, %v1961_v28  ;;  %v3164_v22 = vld [vmem:[%s5212_s4 + $0x10] sm:$0xff] }
 0x26b   : > { %v2245_v23 = vrot.slane %v3164_v22, %v4722_v44  ;;  %v2162_v25 = vrot.slane %v3164_v22, %v4715_v5 }
 0x26c   : > { %v1966_v32 = vadd.f32 %v1965_v26, %v1960_v29  ;;  %v1969_v33 = vadd.f32 %v1967_v30, %v4729_v57  ;;  %v2328_v26 = vrot.slane %v3164_v22, %v4726_v50  ;;  %v2411_v29 = vrot.slane %v3164_v22, %v4941_v39 }
 0x26e   : > { %v1968_v31 = vadd.f32 %v1966_v32, %v4731_v58 }
 0x270   : > { %3654 = vmatprep.mubr.f32.mxu1 %v1968_v31 }
 0x271   : > { %3655 = vmatmul.mubr.f32.vlgmr.msra.gmra.mxu1 %v1969_v33 }
 0x272   : > { %3703 = vmatprep.mubr.msk.f32.mxu1 %vm1146_vm1, %v4834_v8  ;;  %v3190_v8 = vld [vmem:[%s5213_s5 + $0xa0] sm:$0xff] }
 0x331   : > { %v3656_v35 = vpop.f32.mrf.mxu1 }
 0x332   : > { %v2062_v37 = vadd.f32 %v3656_v35, %v1989_v34 }
 0x333   : > { %v2056_v41 = vpop.f32.mrf.mxu1 }
 0x334   : > { %v2066_v42 = vmax.f32 %v2062_v37, 0.0  ;;  %v2057_v52 = vadd.f32 %v2056_v41, %v1989_v34  ;;  %v2494_v34 = vrot.slane %v3164_v22, %v4946_v43 }
 0x336   : > { %v2072_v40 = vmul.f32 %v2070_v38, %v2066_v42  ;;  %v2065_v58 = vmax.f32 %v2057_v52, 0.0 }
 0x338   : > { %v4976_v45 = vadd.f32 %v2076_v47, %v2072_v40  ;;  %v2071_v57 = vmul.f32 %v2070_v38, %v2065_v58  ;;  %v2577_v40 = vrot.slane %v3164_v22, %v4949_v46  ;;  %v2660_v58 = vrot.slane %v3164_v22, %v1764_v51  ;;  %v3185_v51 = vld [vmem:[%s5212_s4 + $0x18] ss:$0 sm:$0xff] }
 0x33a   : > { %v4978_v48 = vadd.f32 %v2076_v47, %v2071_v57  ;;  %3657 = vmatprep.subr.mxu0 %v4976_v45  ;;  %3699 = vmatprep.subr.mxu1 %v4976_v45 }
 0x33b   : > { %3658 = vmatpush3.msra.mxu0 %v4976_v45  ;;  %3700 = vmatpush3.msra.mxu1 %v4976_v45 }
 0x33c   : > { %3659 = vmatprep.subr.mxu0 %v4978_v48  ;;  %3701 = vmatprep.subr.mxu1 %v4978_v48 }
 0x33d   : > { %3660 = vmatpush3.msra.mxu0 %v4978_v48  ;;  %3702 = vmatpush3.msra.mxu1 %v4978_v48 }
 0x33e   : > { %3662 = vmatmul.mubr.msk.f32.vlgmr.msra.gmra.mxu0 %vm1146_vm1, %v4738_v59  ;;  %3664 = vmatprep.subr.mxu0 %v4976_v45  ;;  %v3201_v59 = vld [vmem:[%s5213_s5 + $0xf8] sm:$0xff] }
 0x33f   : > { %3713 = vmatprep.subr.mxu1 %v4976_v45  ;;  %3665 = vmatpush3.msra.mxu0 %v4976_v45 }
 0x340   : > { %3704 = vmatmul.mubr.msk.f32.vlgmr.msra.gmra.mxu1 %vm1146_vm1, %v4846_v9  ;;  %3666 = vmatprep.subr.mxu0 %v4978_v48  ;;  %v3189_v9 = vld [vmem:[%s5213_s5 + $0x98] sm:$0xff] }
 0x341   : > { %3714 = vmatpush3.msra.mxu1 %v4976_v45  ;;  %3667 = vmatpush3.msra.mxu0 %v4978_v48 }
 0x342   : > { %3715 = vmatprep.subr.mxu1 %v4978_v48  ;;  %3668 = vmatprep.mubr.msk.f32.mxu0 %vm1146_vm1, %v4744_v60  ;;  %v3200_v60 = vld [vmem:[%s5213_s5 + $0xf0] sm:$0xff] }
 0x343   : > { %3716 = vmatpush3.msra.mxu1 %v4978_v48  ;;  %3669 = vmatmul.mubr.msk.f32.vlgmr.msra.gmra.mxu0 %vm1146_vm1, %v4756_v61  ;;  %v3199_v61 = vld [vmem:[%s5213_s5 + $0xe8] sm:$0xff] }
 0x344   : > { %3671 = vmatprep.subr.mxu0 %v4976_v45  ;;  %3675 = vmatprep.mubr.msk.f32.mxu0 %vm1146_vm1, %v4762_v62  ;;  %v3198_v62 = vld [vmem:[%s5213_s5 + $0xe0] sm:$0xff] }
 0x345   : > { %3672 = vmatpush3.msra.mxu0 %v4976_v45  ;;  %3717 = vmatprep.mubr.msk.f32.mxu1 %vm1146_vm1, %v4870_v12  ;;  %v3186_v12 = vld [vmem:[%s5213_s5 + $0x80] sm:$0xff] }
 0x346   : > { %3673 = vmatprep.subr.mxu0 %v4978_v48  ;;  %3718 = vmatmul.mubr.msk.f32.vlgmr.msra.gmra.mxu1 %vm1146_vm1, %v4882_v13  ;;  %v2978_v13 = vld [vmem:[%s5215_s7 + $0x78] sm:$0xff] }
 0x347   : > { %3674 = vmatpush3.msra.mxu0 %v4978_v48  ;;  %3755 = vmatprep.subr.mxu1 %v2978_v13 }
 0x348   : > { %3676 = vmatmul.mubr.msk.f32.vlgmr.msra.gmra.mxu0 %vm1146_vm1, %v4774_v63  ;;  %3678 = vmatprep.subr.mxu0 %v4976_v45  ;;  %v3197_v63 = vld [vmem:[%s5213_s5 + $0xd8] sm:$0xff] }
 0x349   : > { %3679 = vmatpush3.msra.mxu0 %v4976_v45  ;;  %3682 = vmatprep.mubr.msk.f32.mxu0 %vm1146_vm1, %v4780_v0  ;;  %v3196_v0 = vld [vmem:[%s5213_s5 + $0xd0] sm:$0xff] }
 0x34a   : > { %3680 = vmatprep.subr.mxu0 %v4978_v48  ;;  %3756 = vmatpush3.msra.mxu1 %v2978_v13 }
 0x34b   : > { %3681 = vmatpush3.msra.mxu0 %v4978_v48  ;;  %3757 = vmatprep.subr.mxu1 %v2977_v36 }
 0x34c   : > { %3683 = vmatmul.mubr.msk.f32.vlgmr.msra.gmra.mxu0 %vm1146_vm1, %v4792_v1  ;;  %3685 = vmatprep.subr.mxu0 %v4976_v45  ;;  %v3195_v1 = vld [vmem:[%s5213_s5 + $0xc8] sm:$0xff] }
 0x34d   : > { %3686 = vmatpush3.msra.mxu0 %v4976_v45  ;;  %3689 = vmatprep.mubr.msk.f32.mxu0 %vm1146_vm1, %v4798_v3  ;;  %v3194_v3 = vld [vmem:[%s5213_s5 + $0xc0] sm:$0xff] }
 0x34e   : > { %3687 = vmatprep.subr.mxu0 %v4978_v48  ;;  %3758 = vmatpush3.msra.mxu1 %v2977_v36 }
 0x34f   : > { %3688 = vmatpush3.msra.mxu0 %v4978_v48  ;;  %3759 = vmatprep.subr.mxu1 %v2976_v49 }
 0x350   : > { %3690 = vmatmul.mubr.msk.f32.vlgmr.msra.gmra.mxu0 %vm1146_vm1, %v4810_v4  ;;  %3692 = vmatprep.subr.mxu0 %v4976_v45  ;;  %v3193_v4 = vld [vmem:[%s5213_s5 + $0xb8] sm:$0xff] }
 0x351   : > { %3693 = vmatpush3.msra.mxu0 %v4976_v45  ;;  %3696 = vmatprep.mubr.msk.f32.mxu0 %vm1146_vm1, %v4816_v6  ;;  %v3192_v6 = vld [vmem:[%s5213_s5 + $0xb0] sm:$0xff] }
 0x352   : > { %3694 = vmatprep.subr.mxu0 %v4978_v48  ;;  %3760 = vmatpush3.msra.mxu1 %v2976_v49 }
 0x353   : > { %3695 = vmatpush3.msra.mxu0 %v4978_v48  ;;  %3761 = vmatprep.subr.mxu1 %v2975_v53 }
 0x354   : > { %3697 = vmatmul.mubr.msk.f32.vlgmr.msra.gmra.mxu0 %vm1146_vm1, %v4828_v7  ;;  %3706 = vmatprep.subr.mxu0 %v4976_v45  ;;  %v3191_v7 = vld [vmem:[%s5213_s5 + $0xa8] sm:$0xff] }
 0x355   : > { %3707 = vmatpush3.msra.mxu0 %v4976_v45  ;;  %3710 = vmatprep.mubr.msk.f32.mxu0 %vm1146_vm1, %v4852_v10  ;;  %v3188_v10 = vld [vmem:[%s5213_s5 + $0x90] sm:$0xff] }
 0x356   : > { %3708 = vmatprep.subr.mxu0 %v4978_v48  ;;  %3762 = vmatpush3.msra.mxu1 %v2975_v53 }
 0x357   : > { %3709 = vmatpush3.msra.mxu0 %v4978_v48  ;;  %3763 = vmatprep.subr.mxu1 %v2974_v54 }
 0x358   : > { %3711 = vmatmul.mubr.msk.f32.vlgmr.msra.gmra.mxu0 %vm1146_vm1, %v4864_v11  ;;  %3720 = vmatprep.subr.mxu0 %v3201_v59  ;;  %v3187_v11 = vld [vmem:[%s5213_s5 + $0x88] sm:$0xff] }
 0x359   : > { %3721 = vmatpush3.msra.mxu0 %v3201_v59  ;;  %3764 = vmatpush3.msra.mxu1 %v2974_v54 }
 0x35a   : > { %3722 = vmatprep.subr.mxu0 %v3200_v60  ;;  %3765 = vmatprep.subr.mxu1 %v2973_v55 }
 0x35b   : > { %3723 = vmatpush3.msra.mxu0 %v3200_v60  ;;  %3766 = vmatpush3.msra.mxu1 %v2973_v55 }
 0x35c   : > { %3724 = vmatprep.subr.mxu0 %v3199_v61  ;;  %3767 = vmatprep.subr.mxu1 %v2972_v56 }
 0x35d   : > { %3725 = vmatpush3.msra.mxu0 %v3199_v61  ;;  %3768 = vmatpush3.msra.mxu1 %v2972_v56 }
 0x35e   : > { %3726 = vmatprep.subr.mxu0 %v3198_v62  ;;  %3769 = vmatprep.subr.mxu1 %v2971_v14 }
 0x35f   : > { %3727 = vmatpush3.msra.mxu0 %v3198_v62  ;;  %3770 = vmatpush3.msra.mxu1 %v2971_v14 }
 0x360   : > { %3728 = vmatprep.subr.mxu0 %v3197_v63  ;;  %3771 = vmatprep.subr.mxu1 %v2970_v16 }
 0x361   : > { %3729 = vmatpush3.msra.mxu0 %v3197_v63  ;;  %3772 = vmatpush3.msra.mxu1 %v2970_v16 }
 0x362   : > { %3730 = vmatprep.subr.mxu0 %v3196_v0  ;;  %3773 = vmatprep.subr.mxu1 %v2969_v17 }
 0x363   : > { %3731 = vmatpush3.msra.mxu0 %v3196_v0  ;;  %3774 = vmatpush3.msra.mxu1 %v2969_v17 }
 0x364   : > { %3732 = vmatprep.subr.mxu0 %v3195_v1 }
 0x365   : > { %3733 = vmatpush3.msra.mxu0 %v3195_v1 }
 0x366   : > { %3734 = vmatprep.subr.mxu0 %v3194_v3 }
 0x367   : > { %3735 = vmatpush3.msra.mxu0 %v3194_v3 }
 0x368   : > { %3736 = vmatprep.subr.mxu0 %v3193_v4 }
 0x369   : > { %3737 = vmatpush3.msra.mxu0 %v3193_v4 }
 0x36a   : > { %3738 = vmatprep.subr.mxu0 %v3192_v6 }
 0x36b   : > { %3739 = vmatpush3.msra.mxu0 %v3192_v6  ;;  %v2743_v6 = vrot.slane %v3164_v22, %v1853_v15 }
 0x36c   : > { %3740 = vmatprep.subr.mxu0 %v3191_v7 }
 0x36d   : > { %3741 = vmatpush3.msra.mxu0 %v3191_v7 }
 0x36e   : > { %3742 = vmatprep.subr.mxu0 %v3190_v8 }
 0x36f   : > { %3743 = vmatpush3.msra.mxu0 %v3190_v8 }
 0x370   : > { %3744 = vmatprep.subr.mxu0 %v3189_v9 }
 0x371   : > { %3745 = vmatpush3.msra.mxu0 %v3189_v9 }
 0x372   : > { %3746 = vmatprep.subr.mxu0 %v3188_v10 }
 0x373   : > { %3747 = vmatpush3.msra.mxu0 %v3188_v10 }
 0x374   : > { %3748 = vmatprep.subr.mxu0 %v3187_v11 }
 0x375   : > { %3749 = vmatpush3.msra.mxu0 %v3187_v11 }
 0x376   : > { %3750 = vmatprep.subr.mxu0 %v3186_v12 }
 0x377   : > { %3751 = vmatpush3.msra.mxu0 %v3186_v12 }
 0x3fe   : > { %v3663_v18 = vpop.f32.mrf.mxu0 }
 0x3ff   : > { %v2164_v32 = vmul.f32 %v3663_v18, %v2162_v25 }
 0x400   : > { %v2150_v19 = vpop.f32.mrf.mxu0  ;;  %v3705_v37 = vpop.f32.mrf.mxu1 }
 0x401   : > { %v2163_v38 = vmul.f32 %v2162_v25, %v2150_v19  ;;  %v2662_v10 = vmul.f32 %v3705_v37, %v2660_v58 }
 0x402   : > { %v2648_v63 = vpop.f32.mrf.mxu1 }
 0x403   : > { %v3670_v20 = vpop.f32.mrf.mxu0  ;;  %v2661_v53 = vmul.f32 %v2660_v58, %v2648_v63 }
 0x404   : > { %v2247_v27 = vmul.f32 %v3670_v20, %v2245_v23 }
 0x405   : > { %v2233_v21 = vpop.f32.mrf.mxu0 }
 0x406   : > { %v2246_v31 = vmul.f32 %v2245_v23, %v2233_v21  ;;  %v2249_v41 = vadd.f32 %v2247_v27, %v2164_v32  ;;  %v3719_v12 = vpop.f32.mrf.mxu1  ;;  %v2834_v21 = vrot.slane %v3166_v2, %v4715_v5 }
 0x407   : > { %v2828_v14 = vmul.f32 %v3719_v12, %v3185_v51 }
 0x408   : > { %v3677_v24 = vpop.f32.mrf.mxu0  ;;  %v2248_v57 = vadd.f32 %v2246_v31, %v2163_v38  ;;  %v2814_v17 = vpop.f32.mrf.mxu1  ;;  %v2964_v38 = vld [vmem:[%s5215_s7 + $0x8] sm:$0xff] }
 0x409   : > { %v2330_v33 = vmul.f32 %v3677_v24, %v2328_v26  ;;  %v2827_v24 = vmul.f32 %v3185_v51, %v2814_v17  ;;  %v3066_v51 = vld [vmem:[%s5216_s8] sm:$0x1] }
 0x40a   : > { %v2316_v28 = vpop.f32.mrf.mxu0 }
 0x40b   : > { %v2329_v42 = vmul.f32 %v2328_v26, %v2316_v28  ;;  %v2332_v59 = vadd.f32 %v2330_v33, %v2249_v41  ;;  %v2842_v26 = vrot.slane %v3166_v2, %v4722_v44  ;;  %v2968_v44 = vld [vmem:[%s5215_s7 + $0x28] sm:$0xff]  ;;  %v2963_v41 = vld [vmem:[%s5215_s7] sm:$0xff] }
 0x40c   : > { %v3684_v30 = vpop.f32.mrf.mxu0  ;;  %3775 = vmatprep.subr.mxu1 %v2968_v44 }
 0x40d   : > { %v2413_v47 = vmul.f32 %v3684_v30, %v2411_v29  ;;  %v2331_v0 = vadd.f32 %v2329_v42, %v2248_v57  ;;  %v2848_v30 = vrot.slane %v3166_v2, %v4726_v50  ;;  %3776 = vmatpush3.msra.mxu1 %v2968_v44  ;;  %v2967_v50 = vld [vmem:[%s5215_s7 + $0x20] sm:$0xff]  ;;  %v2873_v42 = vrot.slane %v3166_v2, %v4941_v39 }
 0x40e   : > { %v2399_v35 = vpop.f32.mrf.mxu0  ;;  %3777 = vmatprep.subr.mxu1 %v2967_v50 }
 0x40f   : > { %v2412_v60 = vmul.f32 %v2411_v29, %v2399_v35  ;;  %v2415_v1 = vadd.f32 %v2413_v47, %v2332_v59  ;;  %3778 = vmatpush3.msra.mxu1 %v2967_v50 }
 0x410   : > { %v3691_v52 = vpop.f32.mrf.mxu0 }
 0x411   : > { %v2496_v61 = vmul.f32 %v3691_v52, %v2494_v34  ;;  %v2414_v7 = vadd.f32 %v2412_v60, %v2331_v0 }
 0x412   : > { %v2482_v62 = vpop.f32.mrf.mxu0 }
 0x413   : > { %v2495_v3 = vmul.f32 %v2494_v34, %v2482_v62  ;;  %v2498_v8 = vadd.f32 %v2496_v61, %v2415_v1  ;;  %v2960_v62 = vrot.slane %v3166_v2, %v4949_v46 }
 0x414   : > { %v3698_v4 = vpop.f32.mrf.mxu0 }
 0x415   : > { %v2579_v9 = vmul.f32 %v3698_v4, %v2577_v40  ;;  %v2497_v13 = vadd.f32 %v2495_v3, %v2414_v7 }
 0x416   : > { %v2565_v11 = vpop.f32.mrf.mxu0 }
 0x417   : > { %v2581_v36 = vadd.f32 %v2579_v9, %v2498_v8  ;;  %v2578_v49 = vmul.f32 %v2577_v40, %v2565_v11  ;;  %v2954_v40 = vrot.slane %v3166_v2, %v4946_v43 }
 0x418   : > { %v3712_v54 = vpop.f32.mrf.mxu0 }
 0x419   : > { %v2580_v15 = vadd.f32 %v2578_v49, %v2497_v13  ;;  %v2664_v55 = vadd.f32 %v2662_v10, %v2581_v36  ;;  %v2745_v56 = vmul.f32 %v3712_v54, %v2743_v6 }
 0x41a   : > { %v2731_v16 = vpop.f32.mrf.mxu0 }
 0x41b   : > { %v2663_v18 = vadd.f32 %v2661_v53, %v2580_v15  ;;  %v2747_v19 = vadd.f32 %v2745_v56, %v2664_v55  ;;  %v2744_v20 = vmul.f32 %v2743_v6, %v2731_v16 }
 0x41d   : > { %v2746_v22 = vadd.f32 %v2744_v20, %v2663_v18  ;;  %v2830_v23 = vadd.f32 %v2828_v14, %v2747_v19 }
 0x41f   : > { %v2836_v25 = vadd.f32 %v2834_v21, %v2830_v23  ;;  %v2829_v28 = vadd.f32 %v2827_v24, %v2746_v22 }
 0x421   : > { %v2838_v27 = vmax.f32 %v2836_v25, 0.0  ;;  %v2835_v29 = vadd.f32 %v2834_v21, %v2829_v28 }
 0x423   : > { %v2844_v32 = vmul.f32 %v2842_v26, %v2838_v27  ;;  %v2837_v31 = vmax.f32 %v2835_v29, 0.0 }
 0x425   : > { %v2843_v33 = vmul.f32 %v2842_v26, %v2837_v31  ;;  %v2850_v34 = vadd.f32 %v2848_v30, %v2844_v32 }
 0x427   : > { %v2849_v35 = vadd.f32 %v2848_v30, %v2843_v33  ;;  %v2852_v5 = vadd.f32 %v2850_v34, %v4976_v45  ;;  %v2965_v45 = vld [vmem:[%s5215_s7 + $0x10] sm:$0xff] }
 0x429   : > { %v2851_v37 = vadd.f32 %v2849_v35, %v4978_v48  ;;  %v2966_v48 = vld [vmem:[%s5215_s7 + $0x18] sm:$0xff] }
 0x42a   : > { %3779 = vmatprep.subr.mxu1 %v2966_v48 }
 0x42b   : > { %3752 = vmatprep.mubr.f32.mxu0 %v2851_v37  ;;  %3780 = vmatpush3.msra.mxu1 %v2966_v48 }
 0x42c   : > { %3753 = vmatmul.mubr.f32.vlgmr.msra.gmra.mxu0 %v2852_v5  ;;  %3781 = vmatprep.subr.mxu1 %v2965_v45 }
 0x42d   : > { %3782 = vmatpush3.msra.mxu1 %v2965_v45 }
 0x42e   : > { %3783 = vmatprep.subr.mxu1 %v2964_v38 }
 0x42f   : > { %3784 = vmatpush3.msra.mxu1 %v2964_v38 }
 0x430   : > { %3785 = vmatprep.subr.mxu1 %v2963_v41 }
 0x431   : > { %3786 = vmatpush3.msra.mxu1 %v2963_v41 }
 0x4ec   : > { %v3754_v47 = vpop.f32.mrf.mxu0 }
 0x4ed   : > { %v2946_v52 = vadd.f32 %v3754_v47, %v2873_v42 }
 0x4ee   : > { %v2940_v58 = vpop.f32.mrf.mxu0 }
 0x4ef   : > { %v2950_v57 = vmax.f32 %v2946_v52, 0.0  ;;  %v2941_v59 = vadd.f32 %v2940_v58, %v2873_v42 }
 0x4f1   : > { %v2949_v60 = vmax.f32 %v2941_v59, 0.0  ;;  %v2956_v61 = vmul.f32 %v2954_v40, %v2950_v57 }
 0x4f3   : > { %v2955_v63 = vmul.f32 %v2954_v40, %v2949_v60  ;;  %v2962_v1 = vadd.f32 %v2960_v62, %v2956_v61 }
 0x4f5   : > { %v2961_v0 = vadd.f32 %v2960_v62, %v2955_v63 }
 0x4f7   : > { %3787 = vmatprep.mubr.f32.mxu1 %v2961_v0 }
 0x4f8   : > { %3788 = vmatmul.mubr.f32.vlgmr.msra.gmra.mxu1 %v2962_v1 }
 0x5b8   : > { %v3789_v3 = vpop.f32.mrf.mxu1 }
 0x5b9   : > { %v3056_v4 = vsel %vm3054_vm2, %v3789_v3, 0.0 }
 0x5ba   : > { %v3045_v39 = vpop.f32.mrf.mxu1 }
 0x5bb   : > { %v3055_v6 = vsel %vm3054_vm2, %v3045_v39, 0.0 }
 0x5bc   : > { %v3057_v43 = vadd.f32 %v3056_v4, %v3055_v6 }
 0x5be   : > { %v3058_v7 = vrot.slane %v3057_v43, 4 }
 0x5c0   : > { %v3059_v8 = vadd.f32 %v3058_v7, %v3057_v43 }
 0x5c2   : > { %v3060_v9 = vrot.slane %v3059_v8, 2 }
 0x5c4   : > { %v3061_v10 = vadd.f32 %v3060_v9, %v3059_v8 }
 0x5c6   : > { %v3062_v11 = vrot.slane %v3061_v10, 1 }
 0x5c8   : > { %v3063_v46 = vadd.f32 %v3062_v11, %v3061_v10 }
 0x5ca   : > { %v3065_v12 = vmul.f32 0.0625, %v3063_v46 }
 0x5cc   : > { %v3067_v13 = vadd.f32 %v3066_v51, %v3065_v12 }
 0x5ce   : > { %3069 = vst.msk [vmem:[%s324_s26] sm:$0x1] %vm3068_vm3, %v3067_v13 }
 0x5cf   : > { %3844 = shalt.err (!%p3841_p3)
}
 0x5d0   : > { %s3845_s21 = scalar_lea.hbm %s3081_s16, 16  ;;  %s3849_s26 = scalar_lea.hbm %s5217_s9, 32 }
 0x5d1   : > { %p3846_p4 = scmp.ne.s32.totalorder %s3081_s16, %s3845_s21  ;;  %p3850_p9 = scmp.lt.s32.totalorder %s3081_s16, %s5217_s9 }
 0x5d2   : > { %p3851_p10 = scmp.lt.s32.totalorder %s3849_s26, %s3845_s21 }
 0x5d3   : > { %p3847_p7 = pnand %p3846_p4, %p3983_p5 }
 0x5d4   : > { %p3852_p11 = por %p3851_p10, %p3850_p9 }
 0x5d5   : > { %p3848_p8 = pneg %p3847_p7 }
 0x5d7   : > { %p3853_p12 = pnand %p3852_p11, %p3848_p8 }
 0x5d9   : > { %3856 = shalt.err (!%p3853_p12)
}
 0x5da   : > { %3791 = dma.vmem_to_hbm [thread:$0]  (%p3983_p5), %s3084_s28, 16, %s3081_s16, %s3071_s17  }
 0x5db PF: > { %p3797_p13 = scmp.ge.s32.totalorder %s3891_s12, 2  ;;  %s3095_s22 = sand.u32 1, %s3879_s30  }
 0x5dc   : > { %s3096_s23 = scalar_lea.sflag [#allocation3], %s3095_s22 }
 0x5dd   : > { %p3794_p0 = pnand %p3797_p13, %p3987_p6 }
 0x5df   : > { %p3795_p1 = pneg %p3794_p0 }
 0x5e1   : > { %3874 = dma.done.wait (%p3795_p1), %s3096_s23, 16  }
 0x5e2   : > { %3876 = vsyncadd (%p3795_p1), %s3096_s23, 4294967280  ;;  %p19_p2 = scmp.ge.s32.totalorder %s3970_s15, 4   ;;  %s5220_s30 = smov %s3883_s10 }
 0x5e3   : > { %s5221_s10 = smov %s3887_s11  ;;  %s5222_s11 = smov %s3981_s18 }
 0x5e4   : > { %s5223_s12 = smov %s3970_s15  ;;  %21 = sbr.rel (!%p19_p2) target bundleno = 3 (0x3), region = 94 }
 0x5e9   :  { %3100 = vsyncpa [#allocation3], 1 }
 0x5ea   :  { %3102 = vsyncpa [#allocation3 + $0x1], 1 }

</bundles_post_ra>
